<compile_context>
chip_gen: v6e
topology: v6e:2x2x1
jax: 0.10.0
libtpu: 0.0.40
codegen_flags: <defaults>
</compile_context>

<pallas_src>
import functools
import math

import jax
import jax.numpy as jnp
from jax.experimental import pallas as pl
from jax.experimental.pallas import tpu as pltpu


# ----------------------------------------------------------------------------
# Capability / hardware helpers
# ----------------------------------------------------------------------------
_SINGLE_BUFFER_OK = None


def _single_buffer_supported():
    """Probe once whether pl.Buffered(1) is accepted as a BlockSpec pipeline_mode."""
    global _SINGLE_BUFFER_OK
    if _SINGLE_BUFFER_OK is not None:
        return _SINGLE_BUFFER_OK
    try:
        def _probe(a_ref, o_ref):
            o_ref[...] = a_ref[...] + 1.0

        out = pl.pallas_call(
            _probe,
            out_shape=jax.ShapeDtypeStruct((8, 128), jnp.float32),
            grid=(2,),
            in_specs=[pl.BlockSpec((8, 128), lambda i: (0, 0),
                                   pipeline_mode=pl.Buffered(1))],
            out_specs=pl.BlockSpec((8, 128), lambda i: (0, 0)),
        )(jnp.zeros((8, 128), jnp.float32))
        jax.block_until_ready(out)
        _SINGLE_BUFFER_OK = bool(jnp.all(out == 1.0))
    except Exception:  # kwarg missing / lowering rejects -> plain double buffering
        _SINGLE_BUFFER_OK = False
    return _SINGLE_BUFFER_OK


def _vmem_capacity_bytes():
    try:
        return int(pltpu.get_tpu_info().vmem_capacity_bytes)
    except Exception:
        return 64 << 20  # conservative: v7x per-TensorCore VMEM


def _choose_inner_tile(inner, H, tm, budget):
    """Largest chunk of `inner` (dividing it evenly, lane/sublane aligned for bf16)
    whose per-grid-step VMEM footprint fits in `budget`."""
    chosen = inner
    for div in (1, 2, 4, 8, 16, 32, 64):
        if inner % div:
            continue
        tk = inner // div
        if div > 1 and (tk % 256 or tk < 256):
            continue
        per_k = (2 * (2 * H * tk) * 2        # W1 + W2 chunks, bf16, double-buffered
                 + 2 * tk * 4                # b1 chunk, f32, double-buffered
                 + tm * tk * (4 + 2))        # f32 hidden chunk + bf16 copy
        chosen = tk
        if per_k <= budget:
            return tk
    return chosen


# ----------------------------------------------------------------------------
# Fused kernel: PositionwiseFF (inner-chunked) + residual + slp-LayerNorm
# grid = (row_tiles ["parallel"], inner_chunks ["arbitrary"])
# ----------------------------------------------------------------------------
def _sublayer2_kernel(x_ref, w1_ref, b1_ref, w2_ref, b2_ref, g_ref, bta_ref,
                      o_ref, acc_ref, *, eps, inv_denom):
    k = pl.program_id(1)

    @pl.when(k == 0)
    def _init():
        acc_ref[...] = jnp.zeros_like(acc_ref)

    x = x_ref[...]                                    # (tm, H), f32 (kept for residual)
    xb = x.astype(jnp.bfloat16)                       # bf16 operand for the MXU

    # h_k = ReLU(x @ W1[:, chunk] + b1[chunk])   -- f32 accumulation, f32 bias/ReLU
    h = jnp.dot(xb, w1_ref[...], preferred_element_type=jnp.float32)
    h = jnp.maximum(h + b1_ref[...], 0.0)             # (tm, tk), f32
    # y += h_k @ W2[chunk, :]                     -- bf16 operands, f32 accumulate
    acc_ref[...] += jnp.dot(h.astype(jnp.bfloat16), w2_ref[...],
                            preferred_element_type=jnp.float32)

    @pl.when(k == pl.num_programs(1) - 1)
    def _finalize():
        # residual + b2 + slp LayerNorm (unbiased std, eps added to std), all f32
        z = x.astype(jnp.float32) + acc_ref[...] + b2_ref[...]
        mean = jnp.mean(z, axis=-1, keepdims=True)
        zc = z - mean
        var = jnp.sum(zc * zc, axis=-1, keepdims=True) * inv_denom   # / (H - 1)
        d = jnp.sqrt(var) + eps
        r = pl.reciprocal(d, approx=True)             # EUP vrcp (own VLIW slot)
        r = r * (2.0 - d * r)                         # one Newton step -> ~f32 accuracy
        o_ref[...] = (g_ref[...] * (zc * r) + bta_ref[...]).astype(o_ref.dtype)


def sublayer2(x, params, *, eps=1e-6, block_rows=512):
    """Fused Sublayer2 forward.  x: [B, S, H]; params: w1[H,inner], b1[inner],
    w2[inner,H], b2[H], ln_g[H], ln_b[H]  (weights stored as [in, out])."""
    B, S, H = x.shape
    w1, b1 = params["w1"], params["b1"]
    w2, b2 = params["w2"], params["b2"]
    gamma, beta = params["ln_g"], params["ln_b"]
    inner = w1.shape[1]

    # bf16 weights for the MXU (biases / LN params stay f32).
    if w1.dtype != jnp.bfloat16:
        w1 = w1.astype(jnp.bfloat16)
    if w2.dtype != jnp.bfloat16:
        w2 = w2.astype(jnp.bfloat16)

    M = B * S
    x2 = x.reshape(M, H)
    x_bytes = jnp.dtype(x.dtype).itemsize

    # ---- row tile: as large as possible, multiple of 8, but >= 2 tiles so both
    #      v7x TensorCores get work (one full-M step per core when M is small). ----
    tm = min(block_rows, M)
    if M > 8 and pl.cdiv(M, tm) < 2:
        half = -(-M // 2)
        tm = max(8, ((half + 7) // 8) * 8)

    # ---- per-generation VMEM budget & inner-dim chunking ----
    vmem_cap = _vmem_capacity_bytes()
    fixed = (2 * tm * H * x_bytes        # x tile (double-buffered)
             + 2 * tm * H * x_bytes      # out tile (double-buffered)
             + tm * H * 4                # f32 accumulator scratch
             + 3 * 2 * H * 4             # b2 / gamma / beta
             + 4 * tm * H * 4)           # LN temporaries + bf16 x copy headroom
    budget = max(vmem_cap - (16 << 20) - fixed, 4 << 20)
    tk = _choose_inner_tile(inner, H, tm, budget)
    nk = inner // tk

    per_k = 2 * (2 * H * tk) * 2 + 2 * tk * 4 + tm * tk * 6
    vmem_limit = int(min(vmem_cap - (8 << 20), max(fixed + per_k + (8 << 20), 32 << 20)))

    # ---- BlockSpecs: single-buffer params whose index map is constant ----
    single_buf = _single_buffer_supported()

    def _spec(shape, index_map, *, const):
        if const and single_buf:
            return pl.BlockSpec(shape, index_map, pipeline_mode=pl.Buffered(1))
        return pl.BlockSpec(shape, index_map)

    grid = (pl.cdiv(M, tm), nk)
    w_const = (nk == 1)
    in_specs = [
        pl.BlockSpec((tm, H), lambda i, k: (i, 0)),                 # x row tile (streams)
        _spec((H, tk), lambda i, k: (0, k), const=w_const),         # W1 chunk (bf16)
        _spec((1, tk), lambda i, k: (0, k), const=w_const),         # b1 chunk
        _spec((tk, H), lambda i, k: (k, 0), const=w_const),         # W2 chunk (bf16)
        _spec((1, H), lambda i, k: (0, 0), const=True),             # b2
        _spec((1, H), lambda i, k: (0, 0), const=True),             # gamma
        _spec((1, H), lambda i, k: (0, 0), const=True),             # beta
    ]

    cost = pl.CostEstimate(
        flops=int(4 * M * H * inner + 10 * M * H),
        transcendentals=int(2 * M),
        bytes_accessed=int(2 * M * H * x_bytes + 2 * H * inner * 2
                           + inner * 4 + 3 * H * 4),
    )

    kernel = functools.partial(_sublayer2_kernel, eps=eps,
                               inv_denom=1.0 / float(max(H - 1, 1)))

    out = pl.pallas_call(
        kernel,
        out_shape=jax.ShapeDtypeStruct((M, H), x.dtype),
        grid=grid,
        in_specs=in_specs,
        out_specs=pl.BlockSpec((tm, H), lambda i, k: (i, 0)),
        scratch_shapes=[pltpu.VMEM((tm, H), jnp.float32)],
        compiler_params=pltpu.CompilerParams(
            dimension_semantics=("parallel", "arbitrary"),
            vmem_limit_bytes=vmem_limit,
        ),
        cost_estimate=cost,
    )(x2, w1, b1.reshape(1, inner), w2, b2.reshape(1, H),
      gamma.reshape(1, H), beta.reshape(1, H))
    return out.reshape(B, S, H)


# ----------------------------------------------------------------------------
# Pure-JAX reference (same slp semantics, f32 weights) + deterministic init
# ----------------------------------------------------------------------------
def sublayer2_ref(x, params, eps=1e-6):
    h = jnp.maximum(x @ params["w1"] + params["b1"], 0.0)
    y = h @ params["w2"] + params["b2"]
    z = x + y
    mean = jnp.mean(z, axis=-1, keepdims=True)
    var = jnp.sum((z - mean) ** 2, axis=-1, keepdims=True) / (x.shape[-1] - 1)
    std = jnp.sqrt(var)
    return params["ln_g"] * (z - mean) / (std + eps) + params["ln_b"]


def xavier_uniform(key, shape):
    fan_in, fan_out = shape
    a = math.sqrt(6.0 / (fan_in + fan_out))
    return jax.random.uniform(key, shape, jnp.float32, minval=-a, maxval=a)


def init_sublayer2(key, H, inner):
    k1, k2, k3, k4, k5, k6 = jax.random.split(key, 6)
    return dict(
        w1=xavier_uniform(k1, (H, inner)),
        b1=0.1 * jax.random.normal(k3, (inner,), jnp.float32),
        w2=xavier_uniform(k2, (inner, H)),
        b2=0.1 * jax.random.normal(k4, (H,), jnp.float32),
        ln_g=1.0 + 0.1 * jax.random.normal(k5, (H,), jnp.float32),
        ln_b=0.1 * jax.random.normal(k6, (H,), jnp.float32),
    )


# ----------------------------------------------------------------------------
if __name__ == "__main__":
    # Small but MXU-meaningful shapes (H >= 256 so the contraction fills v6e/v7x MXUs).
    BATCH, SEQ, HIDDEN, INNER = 2, 64, 256, 1024

    root = jax.random.PRNGKey(0)
    kx, kp = jax.random.split(root)
    params = init_sublayer2(kp, HIDDEN, INNER)
    x = jax.random.normal(kx, (BATCH, SEQ, HIDDEN), jnp.float32)

    _single_buffer_supported()          # populate the probe cache outside jit tracing

    fwd = jax.jit(sublayer2)            # default block_rows=512; rows split across TCs
    out = fwd(x, params)
    jax.block_until_ready(out)

    ref = sublayer2_ref(x, params)
    assert out.shape == (BATCH, SEQ, HIDDEN)
    max_err = float(jnp.max(jnp.abs(out - ref)))
    # bf16 MXU operands (f32 accumulate): loosen tolerance vs. the pure-f32 reference.
    assert jnp.allclose(out, ref, atol=3e-2, rtol=3e-2), f"max abs err {max_err}"
    print("KERNEL_OK")
</pallas_src>

<mosaic_0001>
module attributes {stable_mosaic.version = 11 : i64} {
  func.func @_probe(%arg0: i32, %arg1: memref<8x128xf32, #tpu.memory_space<vmem>>, %arg2: memref<8x128xf32, #tpu.memory_space<vmem>>) attributes {dimension_semantics = [#tpu.dimension_semantics<arbitrary>], iteration_bounds = array<i64: 2>, scalar_prefetch = 0 : i64, scratch_operands = 0 : i64, tpu.core_type = #tpu.core_type<tc>, window_params = [{pipeline_mode = #tpu.pipeline_mode<synchronous>, transform_indices = @transform_0, window_bounds = array<i64: 8, 128>}, {pipeline_mode = #tpu.pipeline_mode<synchronous>, transform_indices = @transform_1, window_bounds = array<i64: 8, 128>}]} {
    %c0 = arith.constant 0 : index
    %c0_0 = arith.constant 0 : index
    %0 = vector.load %arg1[%c0, %c0_0] : memref<8x128xf32, #tpu.memory_space<vmem>>, vector<8x128xf32>
    %cst = arith.constant 1.000000e+00 : f32
    %1 = vector.broadcast %cst : f32 to vector<8x128xf32>
    %2 = arith.addf %0, %1 : vector<8x128xf32>
    %c0_1 = arith.constant 0 : index
    %c0_2 = arith.constant 0 : index
    %3 = vector.load %arg2[%c0_1, %c0_2] : memref<8x128xf32, #tpu.memory_space<vmem>>, vector<8x128xf32>
    tpu.vector_store %arg2[%c0_1, %c0_2], %2 {strides = array<i32>} : memref<8x128xf32, #tpu.memory_space<vmem>>, vector<8x128xf32>,
    return
  }
  func.func @transform_0(%arg0: i32) -> (i32, i32) {
    %c0_i32 = arith.constant 0 : i32
    %c0_i32_0 = arith.constant 0 : i32
    %c0_i32_1 = arith.constant 0 : i32
    return %c0_i32, %c0_i32_0 : i32, i32
  }
  func.func @transform_1(%arg0: i32) -> (i32, i32) {
    %c0_i32 = arith.constant 0 : i32
    %c0_i32_0 = arith.constant 0 : i32
    %c0_i32_1 = arith.constant 0 : i32
    return %c0_i32, %c0_i32_0 : i32, i32
  }
}

module attributes {stable_mosaic.version = 11 : i64} {
  func.func @_sublayer2_kernel(%arg0: i32, %arg1: i32, %arg2: memref<64x256xf32, #tpu.memory_space<vmem>>, %arg3: memref<256x1024xbf16, #tpu.memory_space<vmem>>, %arg4: memref<1x1024xf32, #tpu.memory_space<vmem>>, %arg5: memref<1024x256xbf16, #tpu.memory_space<vmem>>, %arg6: memref<1x256xf32, #tpu.memory_space<vmem>>, %arg7: memref<1x256xf32, #tpu.memory_space<vmem>>, %arg8: memref<1x256xf32, #tpu.memory_space<vmem>>, %arg9: memref<64x256xf32, #tpu.memory_space<vmem>>, %arg10: memref<64x256xf32, #tpu.memory_space<vmem>>) attributes {dimension_semantics = [#tpu.dimension_semantics<parallel>, #tpu.dimension_semantics<arbitrary>], iteration_bounds = array<i64: 2, 1>, scalar_prefetch = 0 : i64, scratch_operands = 1 : i64, tpu.core_type = #tpu.core_type<tc>, window_params = [{transform_indices = @transform_0, window_bounds = array<i64: 64, 256>}, {transform_indices = @transform_1, window_bounds = array<i64: 256, 1024>}, {transform_indices = @transform_2, window_bounds = array<i64: 1, 1024>}, {transform_indices = @transform_3, window_bounds = array<i64: 1024, 256>}, {pipeline_mode = #tpu.pipeline_mode<synchronous>, transform_indices = @transform_4, window_bounds = array<i64: 1, 256>}, {pipeline_mode = #tpu.pipeline_mode<synchronous>, transform_indices = @transform_5, window_bounds = array<i64: 1, 256>}, {pipeline_mode = #tpu.pipeline_mode<synchronous>, transform_indices = @transform_6, window_bounds = array<i64: 1, 256>}, {transform_indices = @transform_7, window_bounds = array<i64: 64, 256>}]} {
    %c0_i32 = arith.constant 0 : i32
    %0 = arith.cmpi eq, %arg1, %c0_i32 : i32
    %1 = arith.extui %0 : i1 to i32
    %c0_i32_0 = arith.constant 0 : i32
    %2 = arith.cmpi ne, %1, %c0_i32_0 : i32
    scf.if %2 {
      %cst_16 = arith.constant 0.000000e+00 : f32
      %21 = vector.broadcast %cst_16 : f32 to vector<64x256xf32>
      %c0_17 = arith.constant 0 : index
      %c0_18 = arith.constant 0 : index
      %22 = vector.load %arg10[%c0_17, %c0_18] : memref<64x256xf32, #tpu.memory_space<vmem>>, vector<64x256xf32>
      tpu.vector_store %arg10[%c0_17, %c0_18], %21 {strides = array<i32>} : memref<64x256xf32, #tpu.memory_space<vmem>>, vector<64x256xf32>,
    } else {
    }
    %c0 = arith.constant 0 : index
    %c0_1 = arith.constant 0 : index
    %3 = vector.load %arg2[%c0, %c0_1] : memref<64x256xf32, #tpu.memory_space<vmem>>, vector<64x256xf32>
    %4 = arith.truncf %3 : vector<64x256xf32> to vector<64x256xbf16>
    %c0_2 = arith.constant 0 : index
    %c0_3 = arith.constant 0 : index
    %5 = vector.load %arg3[%c0_2, %c0_3] : memref<256x1024xbf16, #tpu.memory_space<vmem>>, vector<256x1024xbf16>
    %cst = arith.constant dense<0.000000e+00> : vector<64x1024xf32>
    %6 = tpu.matmul %4, %5, %cst {dimension_numbers = #tpu.dot_dimension_numbers<[1], [0], [0], [1], [0, 0, 1, 1], [], []>} : vector<64x256xbf16>, vector<256x1024xbf16>, vector<64x1024xf32> -> vector<64x1024xf32>
    %c0_4 = arith.constant 0 : index
    %c0_5 = arith.constant 0 : index
    %7 = vector.load %arg4[%c0_4, %c0_5] : memref<1x1024xf32, #tpu.memory_space<vmem>>, vector<1x1024xf32>
    %8 = vector.broadcast %7 : vector<1x1024xf32> to vector<64x1024xf32>
    %9 = arith.addf %6, %8 : vector<64x1024xf32>
    %cst_6 = arith.constant 0.000000e+00 : f32
    %10 = vector.broadcast %cst_6 : f32 to vector<64x1024xf32>
    %11 = arith.maximumf %9, %10 : vector<64x1024xf32>
    %c0_7 = arith.constant 0 : index
    %c0_8 = arith.constant 0 : index
    %12 = vector.load %arg10[%c0_7, %c0_8] : memref<64x256xf32, #tpu.memory_space<vmem>>, vector<64x256xf32>
    %13 = arith.truncf %11 : vector<64x1024xf32> to vector<64x1024xbf16>
    %c0_9 = arith.constant 0 : index
    %c0_10 = arith.constant 0 : index
    %14 = vector.load %arg5[%c0_9, %c0_10] : memref<1024x256xbf16, #tpu.memory_space<vmem>>, vector<1024x256xbf16>
    %cst_11 = arith.constant dense<0.000000e+00> : vector<64x256xf32>
    %15 = tpu.matmul %13, %14, %cst_11 {dimension_numbers = #tpu.dot_dimension_numbers<[1], [0], [0], [1], [0, 0, 1, 1], [], []>} : vector<64x1024xbf16>, vector<1024x256xbf16>, vector<64x256xf32> -> vector<64x256xf32>
    %16 = arith.addf %12, %15 : vector<64x256xf32>
    %c0_12 = arith.constant 0 : index
    %c0_13 = arith.constant 0 : index
    %17 = vector.load %arg10[%c0_12, %c0_13] : memref<64x256xf32, #tpu.memory_space<vmem>>, vector<64x256xf32>
    tpu.vector_store %arg10[%c0_12, %c0_13], %16 {strides = array<i32>} : memref<64x256xf32, #tpu.memory_space<vmem>>, vector<64x256xf32>,
    %c0_i32_14 = arith.constant 0 : i32
    %18 = arith.cmpi eq, %arg1, %c0_i32_14 : i32
    %19 = arith.extui %18 : i1 to i32
    %c0_i32_15 = arith.constant 0 : i32
    %20 = arith.cmpi ne, %19, %c0_i32_15 : i32
    scf.if %20 {
      %c0_16 = arith.constant 0 : index
      %c0_17 = arith.constant 0 : index
      %21 = vector.load %arg10[%c0_16, %c0_17] : memref<64x256xf32, #tpu.memory_space<vmem>>, vector<64x256xf32>
      %22 = arith.addf %3, %21 : vector<64x256xf32>
      %c0_18 = arith.constant 0 : index
      %c0_19 = arith.constant 0 : index
      %23 = vector.load %arg6[%c0_18, %c0_19] : memref<1x256xf32, #tpu.memory_space<vmem>>, vector<1x256xf32>
      %24 = vector.broadcast %23 : vector<1x256xf32> to vector<64x256xf32>
      %25 = arith.addf %22, %24 : vector<64x256xf32>
      %cst_20 = arith.constant dense<0.000000e+00> : vector<64xf32>
      %26 = vector.multi_reduction <add>, %25, %cst_20 [1] : vector<64x256xf32> to vector<64xf32>
      %27 = vector.shape_cast %26 : vector<64xf32> to vector<64x1xf32>
      %cst_21 = arith.constant 2.560000e+02 : f32
      %28 = vector.broadcast %cst_21 : f32 to vector<64x1xf32>
      %29 = arith.divf %27, %28 : vector<64x1xf32>
      %30 = vector.broadcast %29 : vector<64x1xf32> to vector<64x256xf32>
      %31 = arith.subf %25, %30 : vector<64x256xf32>
      %32 = arith.mulf %31, %31 : vector<64x256xf32>
      %cst_22 = arith.constant dense<0.000000e+00> : vector<64xf32>
      %33 = vector.multi_reduction <add>, %32, %cst_22 [1] : vector<64x256xf32> to vector<64xf32>
      %34 = vector.shape_cast %33 : vector<64xf32> to vector<64x1xf32>
      %cst_23 = arith.constant 0.00392156886 : f32
      %35 = vector.broadcast %cst_23 : f32 to vector<64x1xf32>
      %36 = arith.mulf %34, %35 : vector<64x1xf32>
      %37 = math.sqrt %36 : vector<64x1xf32>
      %cst_24 = arith.constant 9.99999997E-7 : f32
      %38 = vector.broadcast %cst_24 : f32 to vector<64x1xf32>
      %39 = arith.addf %37, %38 : vector<64x1xf32>
      %40 = tpu.reciprocal %39 {approx = true} : vector<64x1xf32> -> vector<64x1xf32>
      %41 = arith.mulf %39, %40 : vector<64x1xf32>
      %cst_25 = arith.constant 2.000000e+00 : f32
      %42 = vector.broadcast %cst_25 : f32 to vector<64x1xf32>
      %43 = arith.subf %42, %41 : vector<64x1xf32>
      %44 = arith.mulf %40, %43 : vector<64x1xf32>
      %c0_26 = arith.constant 0 : index
      %c0_27 = arith.constant 0 : index
      %45 = vector.load %arg7[%c0_26, %c0_27] : memref<1x256xf32, #tpu.memory_space<vmem>>, vector<1x256xf32>
      %46 = vector.broadcast %44 : vector<64x1xf32> to vector<64x256xf32>
      %47 = arith.mulf %31, %46 : vector<64x256xf32>
      %48 = vector.broadcast %45 : vector<1x256xf32> to vector<64x256xf32>
      %49 = arith.mulf %48, %47 : vector<64x256xf32>
      %c0_28 = arith.constant 0 : index
      %c0_29 = arith.constant 0 : index
      %50 = vector.load %arg8[%c0_28, %c0_29] : memref<1x256xf32, #tpu.memory_space<vmem>>, vector<1x256xf32>
      %51 = vector.broadcast %50 : vector<1x256xf32> to vector<64x256xf32>
      %52 = arith.addf %49, %51 : vector<64x256xf32>
      %c0_30 = arith.constant 0 : index
      %c0_31 = arith.constant 0 : index
      %53 = vector.load %arg9[%c0_30, %c0_31] : memref<64x256xf32, #tpu.memory_space<vmem>>, vector<64x256xf32>
      tpu.vector_store %arg9[%c0_30, %c0_31], %52 {strides = array<i32>} : memref<64x256xf32, #tpu.memory_space<vmem>>, vector<64x256xf32>,
    } else {
    }
    return
  }
  func.func @transform_0(%arg0: i32, %arg1: i32) -> (i32, i32) {
    %c0_i32 = arith.constant 0 : i32
    %c0_i32_0 = arith.constant 0 : i32
    return %arg0, %c0_i32 : i32, i32
  }
  func.func @transform_1(%arg0: i32, %arg1: i32) -> (i32, i32) {
    %c0_i32 = arith.constant 0 : i32
    %c0_i32_0 = arith.constant 0 : i32
    return %c0_i32, %arg1 : i32, i32
  }
  func.func @transform_2(%arg0: i32, %arg1: i32) -> (i32, i32) {
    %c0_i32 = arith.constant 0 : i32
    %c0_i32_0 = arith.constant 0 : i32
    return %c0_i32, %arg1 : i32, i32
  }
  func.func @transform_3(%arg0: i32, %arg1: i32) -> (i32, i32) {
    %c0_i32 = arith.constant 0 : i32
    %c0_i32_0 = arith.constant 0 : i32
    return %arg1, %c0_i32 : i32, i32
  }
  func.func @transform_4(%arg0: i32, %arg1: i32) -> (i32, i32) {
    %c0_i32 = arith.constant 0 : i32
    %c0_i32_0 = arith.constant 0 : i32
    %c0_i32_1 = arith.constant 0 : i32
    return %c0_i32, %c0_i32_0 : i32, i32
  }
  func.func @transform_5(%arg0: i32, %arg1: i32) -> (i32, i32) {
    %c0_i32 = arith.constant 0 : i32
    %c0_i32_0 = arith.constant 0 : i32
    %c0_i32_1 = arith.constant 0 : i32
    return %c0_i32, %c0_i32_0 : i32, i32
  }
  func.func @transform_6(%arg0: i32, %arg1: i32) -> (i32, i32) {
    %c0_i32 = arith.constant 0 : i32
    %c0_i32_0 = arith.constant 0 : i32
    %c0_i32_1 = arith.constant 0 : i32
    return %c0_i32, %c0_i32_0 : i32, i32
  }
  func.func @transform_7(%arg0: i32, %arg1: i32) -> (i32, i32) {
    %c0_i32 = arith.constant 0 : i32
    %c0_i32_0 = arith.constant 0 : i32
    return %arg0, %c0_i32 : i32, i32
  }
}

</mosaic_0001>

<bundles_post_ra>
// kernel: tpu_custom_call.1
= control target key start
LH: loop header
LB: loop body
LE: loop exit
PB: predicated region body
PF: predicated region fallthrough
CT: control target
= control target key end

     0   :  { %6 = vsyncpa [#allocation3], 0  ;;  %s305_s0 = inlined_call_operand.hbm [shape: f32[8,128], index: 0, kind: input, shape index: {}]   ;;  %s306_s1 = inlined_call_operand.hbm [shape: f32[8,128], index: 1, kind: output, shape index: {}]  }
   0x1   :  { %7 = vsyncpa [#allocation4], 0  ;;  %s258_s6 = smov 0  }
   0x2 LB: > { %s145_s7 = sadd.s32 4294967295, %s244_s6   ;;  %p146_p0 = scmp.ge.s32.totalorder %s244_s6, 1  ;;  %s244_s6 = sphi %s258_s6, %s13_s6  }
   0x3   : > { %p60_p1 = scmp.lt.s32.totalorder %s244_s6, 3  ;;  %p270_p3 = scmp.eq.s32.totalorder %s145_s7, 0 }
   0x4   : > { %s246_s10 = smov [#allocation2]  }
   0x5   : > { %p266_p2 = pnand %p146_p0, %p60_p1  ;;  %s73_s11 = sshll.u32 %s246_s10, 4  ;;  %s74_s11 = int_to_ptr.vmem [resolvable:$true] %s73_s11 }
   0x6   : > { %s191_s12 = scalar_lea.vmem %s74_s11, 128  ;;  %p199_p10 = scmp.lt.s32.totalorder %s74_s11, %s74_s11 }
   0x7   : > { %p162_p4 = pneg %p266_p2  ;;  %p192_p7 = scmp.ne.s32.totalorder %s74_s11, %s191_s12 }
   0x8   : > { %p200_p11 = scmp.lt.s32.totalorder %s191_s12, %s191_s12 }
   0x9   : > { %p163_p5 = pnand %p270_p3, %p162_p4 }
   0xa   : > { %p201_p12 = por %p200_p11, %p199_p10 }
   0xb   : > { %p182_p6 = pneg %p163_p5 }
   0xd   : > { %p194_p8 = pnand %p192_p7, %p182_p6 }
   0xf   : > { %p195_p9 = pneg %p194_p8 }
  0x11   : > { %p202_p13 = pnand %p201_p12, %p195_p9 }
  0x13   : > { %205 = shalt.err (!%p202_p13)
}
  0x14   : > { %165 = dma.hbm_to_vmem [thread:$0]  (!%p163_p5), %s305_s0, 128, %s74_s11, [#allocation3]  }
  0x15   : > { %86 = sbr.rel (%p266_p2) target bundleno = 42 (0x2a), region = 24 }
  0x1a   : > { %235 = dma.done.wait (%p270_p3), [#allocation3], 128  }
  0x1b   : > { %237 = vsyncadd (%p270_p3), [#allocation3], 4294967168  ;;  %s247_s15 = smov [#allocation5]   ;;  %v96_v0 = vld [vmem:[#allocation2] sm:$0xff]  ;;  %p287_p0 = scmp.eq.s32.totalorder %s145_s7, 1 }
  0x1c   : > { %s106_s16 = sshll.u32 %s247_s15, 4  ;;  %v97_v1 = vadd.f32 1.0, %v96_v0  ;;  %s107_s16 = int_to_ptr.vmem [resolvable:$true] %s106_s16 }
  0x1d   : > { %s206_s18 = scalar_lea.vmem %s107_s16, 128  ;;  %p213_p5 = scmp.lt.s32.totalorder %s107_s16, %s107_s16 }
  0x1e   : > { %98 = vst [vmem:[#allocation5] sm:$0xff] %v97_v1  ;;  %p207_p1 = scmp.ne.s32.totalorder %s107_s16, %s206_s18  ;;  %p214_p6 = scmp.lt.s32.totalorder %s206_s18, %s206_s18 }
  0x20   : > { %p208_p2 = pnand %p207_p1, %p287_p0  ;;  %p215_p7 = por %p214_p6, %p213_p5 }
  0x22   : > { %p209_p4 = pneg %p208_p2 }
  0x24   : > { %p216_p3 = pnand %p215_p7, %p209_p4 }
  0x26   : > { %219 = shalt.err (!%p216_p3)
}
  0x27   : > { %159 = dma.vmem_to_hbm [thread:$0]  (%p287_p0), %s107_s16, 128, %s306_s1, [#allocation4]  }
  0x28   : > { %239 = dma.done.wait (%p287_p0), [#allocation4], 128  }
  0x29   : > { %241 = vsyncadd (%p287_p0), [#allocation4], 4294967168 }
  0x2a PF: > { %s13_s6 = sadd.s32 1, %s244_s6  }
  0x2b   : > { %p10_p8 = scmp.ge.s32.totalorder %s13_s6, 4  }
  0x2d   :  { %12 = sbr.rel (!%p10_p8) target bundleno = 2 (0x2), region = 53 }
  0x32   :  { %119 = vsyncpa [#allocation3], 1 }
  0x33   :  { %121 = vsyncpa [#allocation3 + $0x1], 1 }
  0x34   :  { %122 = vsyncpa [#allocation4], 1 }
  0x35   :  { %124 = vsyncpa [#allocation4 + $0x1], 1 }

// kernel: sublayer2.1
= control target key start
LH: loop header
LB: loop body
LE: loop exit
PB: predicated region body
PF: predicated region fallthrough
CT: control target
= control target key end

     0   :  { %12 = vsyncpa [#allocation4], 0  ;;  %s5259_s0 = inlined_call_operand.vmem [shape: f32[128,256], index: 0, kind: input, shape index: {}]   ;;  %s5260_s1 = inlined_call_operand.vmem [shape: bf16[256,1024], index: 1, kind: input, shape index: {}]   ;;  %s5261_s2 = inlined_call_operand.vmem [shape: f32[1,1024], index: 2, kind: input, shape index: {}]   ;;  %s5262_s3 = inlined_call_operand.vmem [shape: bf16[1024,256], index: 3, kind: input, shape index: {}]   ;;  %s5263_s4 = inlined_call_operand.vmem [shape: f32[1,256], index: 4, kind: input, shape index: {}]   ;;  %s5264_s5 = inlined_call_operand.vmem [shape: f32[1,256], index: 5, kind: input, shape index: {}]   ;;  %s5265_s6 = inlined_call_operand.vmem [shape: f32[1,256], index: 6, kind: input, shape index: {}]   ;;  %s5266_s7 = inlined_call_operand.hbm [shape: f32[128,256], index: 7, kind: output, shape index: {}]  }
   0x1   :  { %14 = vsyncpa [#allocation4 + $0x1], 0  ;;  %s3877_s24 = smov 0   ;;  %s3879_s25 = smov 0  }
   0x2   :  { %s3881_s26 = smov 0   ;;  %s3883_s27 = smov 0  }
   0x3   :  { %s3885_s28 = smov 0   ;;  %s3887_s29 = smov 0  }
   0x4 LB: > { %s3182_s30 = sadd.s32 4294967295, %s3832_s29   ;;  %s3183_s8 = sadd.s32 4294967294, %s3832_s29   ;;  %s3832_s29 = sphi %s3887_s29, %s20_s29   ;;  %s3828_s28 = sphi %s3885_s28, %s5273_s28   ;;  %s3824_s27 = sphi %s3883_s27, %s5272_s27   ;;  %s3820_s26 = sphi %s3881_s26, %s5271_s26   ;;  %s3816_s25 = sphi %s3879_s25, %s5270_s25   ;;  %s3812_s24 = sphi %s3877_s24, %s5269_s24  }
   0x5   : > { %s32_s9 = sadd.s32 1, %s3828_s28  ;;  %s206_s10 = sadd.s32 1, %s3820_s26 }
   0x6   : > { %p34_p0 = scmp.ge.s32.totalorder %s32_s9, 2  ;;  %p216_p1 = scmp.ne.s32.totalorder %s3820_s26, %s3816_s25 }
   0x7   : > { %p217_p2 = scmp.eq.s32.totalorder %s3182_s30, 1  ;;  %p222_p3 = scmp.ne.s32.totalorder %s3816_s25, %s3812_s24 }
   0x8   : > { %s5275_s9 = smov (%p34_p0, %s32_s9), 0  ;;  %p223_p5 = scmp.eq.s32.totalorder %s3183_s8, 1 }
   0x9   : > { %p3917_p4 = por %p217_p2, %p216_p1  ;;  %s203_s12 = ssub.s32 %s3828_s28, %s5275_s9 }
   0xa   : > { %p3189_p6 = scmp.ge.s32.totalorder %s3832_s29, 1  ;;  %p204_p7 = scmp.eq.s32.totalorder %s203_s12, 0 }
   0xb   : > { %p3924_p8 = por %p223_p5, %p222_p3  ;;  %p287_p9 = scmp.lt.s32.totalorder %s3832_s29, 3 }
   0xc   : > { %s3930_s14 = scalar_select %p204_p7, %s3820_s26, %s206_s10  }
   0xd   : > { %p288_p10 = pnand %p3189_p6, %p287_p9 }
   0xe   : > { %s3191_s10 = sshll.u32 (!%p288_p10), %s3824_s27, 3  ;;  %s332_s20 = sand.u32 (!%p288_p10), 1, %s3816_s25  }
   0xf   : > { %291 = sbr.rel (%p288_p10) target bundleno = 939 (0x3ab), region = 48  ;;  %p336_p11 = scmp.lt.s32.totalorder (!%p288_p10), %s3191_s10, 15 }
  0x10   : > { %s3190_s21 = sshll.u32 (!%p288_p10), %s332_s20, 7  ;;  %s3458_s23 = sshll.u32 (!%p288_p10), %s3824_s27, 11 }
  0x11   : > { %s5142_s22 = scalar_lea.vmem (!%p288_p10), [#allocation3], %s3190_s21  ;;  %s5202_s15 = scalar_lea.hbm (!%p288_p10), %s5266_s7, %s3458_s23 }
  0x12   : > { %s3070_s30 = sshll.u32 (!%p288_p10), %s5142_s22, 4  ;;  %s5214_s27 = scalar_lea.sflag (!%p288_p10), [#allocation4], %s332_s20  ;;  %s5204_s30 = int_to_ptr.vmem [resolvable:$true] %s3070_s30 }
  0x13   : > { %s3756_s16 = scalar_lea.vmem (!%p288_p10), %s5204_s30, 2048 }
  0x14   : > { %v461_v0 = vld [vmem:[%s5260_s1 + $0x1c0] sm:$0xff]  ;;  %v462_v2 = vld [vmem:[%s5260_s1 + $0x1c8] sm:$0xff]  ;;  %s5277_s10 = smov (!%p336_p11, %s3191_s10), 15  ;;  %p3757_p12 = scmp.ne.s32.totalorder %s5204_s30, %s3756_s16 }
  0x15   : > { %v465_v1 = vld [vmem:[%s5260_s1 + $0x1e0] sm:$0xff]  ;;  %v466_v4 = vld [vmem:[%s5260_s1 + $0x1e8] sm:$0xff]  ;;  %s3456_s12 = sshll.u32 %s5277_s10, 4 }
  0x16   : > { %v3251_v3 = vcombine.high %v461_v0, %v465_v1  ;;  %v3250_v5 = vcombine.low %v461_v0, %v465_v1  ;;  %v453_v6 = vld [vmem:[%s5260_s1 + $0x180] sm:$0xff]  ;;  %v3253_v8 = vcombine.high %v462_v2, %v466_v4  ;;  %v3252_v9 = vcombine.low %v462_v2, %v466_v4  ;;  %v454_v11 = vld [vmem:[%s5260_s1 + $0x188] sm:$0xff]  ;;  %s4014_s10 = scalar_lea.vmem %s5259_s0, %s3456_s12  ;;  %p3758_p13 = pnand %p3757_p12, %p3917_p4 }
  0x17   : > { %v457_v7 = vld [vmem:[%s5260_s1 + $0x1a0] sm:$0xff]  ;;  %v458_v12 = vld [vmem:[%s5260_s1 + $0x1a8] sm:$0xff]  ;;  %v384_v54 = vld [vmem:[%s4014_s10 + $0x18] sm:$0xff] }
  0x18   : > { %v3243_v10 = vcombine.high %v453_v6, %v457_v7  ;;  %v445_v13 = vld [vmem:[%s5260_s1 + $0x140] sm:$0xff]  ;;  %1215 = vmatprep.subr.bf16.mxu0 %v3251_v3  ;;  %v3245_v14 = vcombine.high %v454_v11, %v458_v12  ;;  %v446_v16 = vld [vmem:[%s5260_s1 + $0x148] sm:$0xff]  ;;  %1288 = vmatprep.subr.bf16.mxu1 %v3253_v8  ;;  %v3242_v18 = vcombine.low %v453_v6, %v457_v7  ;;  %p3759_p0 = pneg %p3758_p13 }
  0x19   : > { %v449_v15 = vld [vmem:[%s5260_s1 + $0x160] sm:$0xff]  ;;  %v450_v17 = vld [vmem:[%s5260_s1 + $0x168] sm:$0xff]  ;;  %1216 = vmatpush1.bf16.msra.mxu0 %v3250_v5  ;;  %1289 = vmatpush1.bf16.msra.mxu1 %v3252_v9  ;;  %v3244_v19 = vcombine.low %v454_v11, %v458_v12 }
  0x1a   : > { %1217 = vmatprep.subr.bf16.mxu0 %v3243_v10  ;;  %v3235_v20 = vcombine.high %v445_v13, %v449_v15  ;;  %1290 = vmatprep.subr.bf16.mxu1 %v3245_v14  ;;  %v3237_v21 = vcombine.high %v446_v16, %v450_v17  ;;  %v437_v22 = vld [vmem:[%s5260_s1 + $0x100] sm:$0xff]  ;;  %v438_v24 = vld [vmem:[%s5260_s1 + $0x108] sm:$0xff]  ;;  %v3234_v26 = vcombine.low %v445_v13, %v449_v15 }
  0x1b   : > { %v441_v23 = vld [vmem:[%s5260_s1 + $0x120] sm:$0xff]  ;;  %v442_v25 = vld [vmem:[%s5260_s1 + $0x128] sm:$0xff]  ;;  %v3236_v27 = vcombine.low %v446_v16, %v450_v17 }
  0x1c   : > { %v3227_v28 = vcombine.high %v437_v22, %v441_v23  ;;  %v3229_v29 = vcombine.high %v438_v24, %v442_v25  ;;  %v429_v30 = vld [vmem:[%s5260_s1 + $0xc0] sm:$0xff]  ;;  %v430_v32 = vld [vmem:[%s5260_s1 + $0xc8] sm:$0xff]  ;;  %v3226_v34 = vcombine.low %v437_v22, %v441_v23  ;;  %v3228_v35 = vcombine.low %v438_v24, %v442_v25 }
  0x1d   : > { %1218 = vmatpush1.bf16.msra.mxu0 %v3242_v18  ;;  %1291 = vmatpush1.bf16.msra.mxu1 %v3244_v19  ;;  %v433_v31 = vld [vmem:[%s5260_s1 + $0xe0] sm:$0xff]  ;;  %v434_v33 = vld [vmem:[%s5260_s1 + $0xe8] sm:$0xff] }
  0x1e   : > { %1219 = vmatprep.subr.bf16.mxu0 %v3235_v20  ;;  %1292 = vmatprep.subr.bf16.mxu1 %v3237_v21  ;;  %v3219_v36 = vcombine.high %v429_v30, %v433_v31  ;;  %v3221_v37 = vcombine.high %v430_v32, %v434_v33  ;;  %v421_v38 = vld [vmem:[%s5260_s1 + $0x80] sm:$0xff]  ;;  %v422_v40 = vld [vmem:[%s5260_s1 + $0x88] sm:$0xff]  ;;  %v3218_v42 = vcombine.low %v429_v30, %v433_v31 }
  0x1f   : > { %v425_v39 = vld [vmem:[%s5260_s1 + $0xa0] sm:$0xff]  ;;  %v426_v41 = vld [vmem:[%s5260_s1 + $0xa8] sm:$0xff]  ;;  %v3220_v43 = vcombine.low %v430_v32, %v434_v33 }
  0x20   : > { %v3211_v44 = vcombine.high %v421_v38, %v425_v39  ;;  %v3213_v45 = vcombine.high %v422_v40, %v426_v41  ;;  %v413_v46 = vld [vmem:[%s5260_s1 + $0x40] sm:$0xff]  ;;  %v414_v48 = vld [vmem:[%s5260_s1 + $0x48] sm:$0xff]  ;;  %v3210_v50 = vcombine.low %v421_v38, %v425_v39  ;;  %v3212_v51 = vcombine.low %v422_v40, %v426_v41 }
  0x21   : > { %1220 = vmatpush1.bf16.msra.mxu0 %v3234_v26  ;;  %1293 = vmatpush1.bf16.msra.mxu1 %v3236_v27  ;;  %v417_v47 = vld [vmem:[%s5260_s1 + $0x60] sm:$0xff]  ;;  %v418_v49 = vld [vmem:[%s5260_s1 + $0x68] sm:$0xff] }
  0x22   : > { %1221 = vmatprep.subr.bf16.mxu0 %v3227_v28  ;;  %1294 = vmatprep.subr.bf16.mxu1 %v3229_v29  ;;  %v3203_v52 = vcombine.high %v413_v46, %v417_v47  ;;  %v382_v53 = vld [vmem:[%s4014_s10 + $0x8] sm:$0xff]  ;;  %v3205_v55 = vcombine.high %v414_v48, %v418_v49  ;;  %v405_v56 = vld [vmem:[%s5260_s1] sm:$0xff]  ;;  %v3202_v61 = vcombine.low %v413_v46, %v417_v47 }
  0x23   : > { %v409_v57 = vld [vmem:[%s5260_s1 + $0x20] sm:$0xff]  ;;  %v4030_v58 = vpack.c.bf16 %v384_v54, %v382_v53  ;;  %v406_v59 = vld [vmem:[%s5260_s1 + $0x8] sm:$0xff]  ;;  %v3204_v62 = vcombine.low %v414_v48, %v418_v49 }
  0x24   : > { %v410_v60 = vld [vmem:[%s5260_s1 + $0x28] sm:$0xff]  ;;  %v3195_v63 = vcombine.high %v405_v56, %v409_v57  ;;  %v525_v1 = vld [vmem:[%s5260_s1 + $0x3c0] sm:$0xff]  ;;  %v3194_v5 = vcombine.low %v405_v56, %v409_v57 }
  0x25   : > { %1222 = vmatpush1.bf16.msra.mxu0 %v3226_v34  ;;  %1295 = vmatpush1.bf16.msra.mxu1 %v3228_v35  ;;  %v3197_v0 = vcombine.high %v406_v59, %v410_v60  ;;  %v529_v2 = vld [vmem:[%s5260_s1 + $0x3e0] sm:$0xff]  ;;  %v526_v3 = vld [vmem:[%s5260_s1 + $0x3c8] sm:$0xff]  ;;  %v3196_v6 = vcombine.low %v406_v59, %v410_v60 }
  0x26   : > { %1223 = vmatprep.subr.bf16.mxu0 %v3219_v36  ;;  %1296 = vmatprep.subr.bf16.mxu1 %v3221_v37  ;;  %v530_v4 = vld [vmem:[%s5260_s1 + $0x3e8] sm:$0xff]  ;;  %v3315_v7 = vcombine.high %v525_v1, %v529_v2  ;;  %v517_v9 = vld [vmem:[%s5260_s1 + $0x380] sm:$0xff]  ;;  %v3314_v13 = vcombine.low %v525_v1, %v529_v2 }
  0x27   : > { %1247 = vmatprep.mubr.bf16.mxu0 %v4030_v58  ;;  %1320 = vmatprep.mubr.bf16.mxu1 %v4030_v58  ;;  %v3317_v8 = vcombine.high %v526_v3, %v530_v4  ;;  %v521_v10 = vld [vmem:[%s5260_s1 + $0x3a0] sm:$0xff]  ;;  %v518_v11 = vld [vmem:[%s5260_s1 + $0x388] sm:$0xff]  ;;  %v3316_v14 = vcombine.low %v526_v3, %v530_v4  ;;  %v383_v3 = vld [vmem:[%s4014_s10 + $0x10] sm:$0xff] }
  0x28   : > { %v522_v12 = vld [vmem:[%s5260_s1 + $0x3a8] sm:$0xff]  ;;  %v3307_v15 = vcombine.high %v517_v9, %v521_v10  ;;  %v509_v17 = vld [vmem:[%s5260_s1 + $0x340] sm:$0xff]  ;;  %v3306_v21 = vcombine.low %v517_v9, %v521_v10  ;;  %v463_v4 = vld [vmem:[%s5260_s1 + $0x1d0] sm:$0xff] }
  0x29   : > { %1224 = vmatpush1.bf16.msra.mxu0 %v3218_v42  ;;  %1297 = vmatpush1.bf16.msra.mxu1 %v3220_v43  ;;  %v3309_v16 = vcombine.high %v518_v11, %v522_v12  ;;  %v513_v18 = vld [vmem:[%s5260_s1 + $0x360] sm:$0xff]  ;;  %v510_v19 = vld [vmem:[%s5260_s1 + $0x348] sm:$0xff]  ;;  %v3308_v22 = vcombine.low %v518_v11, %v522_v12  ;;  %v455_v9 = vld [vmem:[%s5260_s1 + $0x190] sm:$0xff] }
  0x2a   : > { %1225 = vmatprep.subr.bf16.mxu0 %v3211_v44  ;;  %1298 = vmatprep.subr.bf16.mxu1 %v3213_v45  ;;  %v514_v20 = vld [vmem:[%s5260_s1 + $0x368] sm:$0xff]  ;;  %v3299_v23 = vcombine.high %v509_v17, %v513_v18  ;;  %v501_v25 = vld [vmem:[%s5260_s1 + $0x300] sm:$0xff]  ;;  %v3298_v29 = vcombine.low %v509_v17, %v513_v18  ;;  %v459_v12 = vld [vmem:[%s5260_s1 + $0x1b0] sm:$0xff] }
  0x2b   : > { %v3301_v24 = vcombine.high %v510_v19, %v514_v20  ;;  %v505_v26 = vld [vmem:[%s5260_s1 + $0x320] sm:$0xff]  ;;  %v502_v27 = vld [vmem:[%s5260_s1 + $0x308] sm:$0xff]  ;;  %v3300_v30 = vcombine.low %v510_v19, %v514_v20  ;;  %v388_v18 = vld [vmem:[%s4014_s10 + $0x38] sm:$0xff] }
  0x2c   : > { %v506_v28 = vld [vmem:[%s5260_s1 + $0x328] sm:$0xff]  ;;  %v3291_v31 = vcombine.high %v501_v25, %v505_v26  ;;  %v493_v33 = vld [vmem:[%s5260_s1 + $0x2c0] sm:$0xff]  ;;  %v3290_v37 = vcombine.low %v501_v25, %v505_v26  ;;  %v448_v25 = vld [vmem:[%s5260_s1 + $0x158] sm:$0xff] }
  0x2d   : > { %1226 = vmatpush1.bf16.msra.mxu0 %v3210_v50  ;;  %1299 = vmatpush1.bf16.msra.mxu1 %v3212_v51  ;;  %v3293_v32 = vcombine.high %v502_v27, %v506_v28  ;;  %v497_v34 = vld [vmem:[%s5260_s1 + $0x2e0] sm:$0xff]  ;;  %v494_v35 = vld [vmem:[%s5260_s1 + $0x2c8] sm:$0xff]  ;;  %v3292_v38 = vcombine.low %v502_v27, %v506_v28  ;;  %v452_v27 = vld [vmem:[%s5260_s1 + $0x178] sm:$0xff] }
  0x2e   : > { %1227 = vmatprep.subr.bf16.mxu0 %v3203_v52  ;;  %1300 = vmatprep.subr.bf16.mxu1 %v3205_v55  ;;  %v498_v36 = vld [vmem:[%s5260_s1 + $0x2e8] sm:$0xff]  ;;  %v3283_v39 = vcombine.high %v493_v33, %v497_v34  ;;  %v485_v41 = vld [vmem:[%s5260_s1 + $0x280] sm:$0xff]  ;;  %v3282_v45 = vcombine.low %v493_v33, %v497_v34  ;;  %v443_v34 = vld [vmem:[%s5260_s1 + $0x130] sm:$0xff] }
  0x2f   : > { %v3285_v40 = vcombine.high %v494_v35, %v498_v36  ;;  %v489_v42 = vld [vmem:[%s5260_s1 + $0x2a0] sm:$0xff]  ;;  %v486_v43 = vld [vmem:[%s5260_s1 + $0x288] sm:$0xff]  ;;  %v3284_v46 = vcombine.low %v494_v35, %v498_v36  ;;  %v3241_v35 = vcombine.high %v448_v25, %v452_v27  ;;  %v440_v36 = vld [vmem:[%s5260_s1 + $0x118] sm:$0xff] }
  0x30   : > { %v490_v44 = vld [vmem:[%s5260_s1 + $0x2a8] sm:$0xff]  ;;  %v3275_v47 = vcombine.high %v485_v41, %v489_v42  ;;  %v477_v49 = vld [vmem:[%s5260_s1 + $0x240] sm:$0xff]  ;;  %v3274_v53 = vcombine.low %v485_v41, %v489_v42  ;;  %v3240_v42 = vcombine.low %v448_v25, %v452_v27  ;;  %v528_v27 = vld [vmem:[%s5260_s1 + $0x3d8] sm:$0xff] }
  0x31   : > { %1228 = vmatpush1.bf16.msra.mxu0 %v3202_v61  ;;  %1301 = vmatpush1.bf16.msra.mxu1 %v3204_v62  ;;  %v3277_v48 = vcombine.high %v486_v43, %v490_v44  ;;  %v481_v50 = vld [vmem:[%s5260_s1 + $0x260] sm:$0xff]  ;;  %v478_v51 = vld [vmem:[%s5260_s1 + $0x248] sm:$0xff]  ;;  %v3276_v54 = vcombine.low %v486_v43, %v490_v44  ;;  %v431_v44 = vld [vmem:[%s5260_s1 + $0xd0] sm:$0xff] }
  0x32   : > { %1229 = vmatprep.subr.bf16.mxu0 %v3195_v63  ;;  %1302 = vmatprep.subr.bf16.mxu1 %v3197_v0  ;;  %v482_v52 = vld [vmem:[%s5260_s1 + $0x268] sm:$0xff]  ;;  %v3267_v55 = vcombine.high %v477_v49, %v481_v50  ;;  %v469_v57 = vld [vmem:[%s5260_s1 + $0x200] sm:$0xff]  ;;  %v3266_v62 = vcombine.low %v477_v49, %v481_v50  ;;  %v436_v49 = vld [vmem:[%s5260_s1 + $0xf8] sm:$0xff] }
  0x33   : > { %v3269_v56 = vcombine.high %v478_v51, %v482_v52  ;;  %v473_v59 = vld [vmem:[%s5260_s1 + $0x220] sm:$0xff]  ;;  %v470_v60 = vld [vmem:[%s5260_s1 + $0x208] sm:$0xff]  ;;  %v3268_v63 = vcombine.low %v478_v51, %v482_v52  ;;  %v423_v52 = vld [vmem:[%s5260_s1 + $0x90] sm:$0xff] }
  0x34   : > { %v474_v61 = vld [vmem:[%s5260_s1 + $0x228] sm:$0xff]  ;;  %v3259_v0 = vcombine.high %v469_v57, %v473_v59  ;;  %v381_v2 = vld [vmem:[%s4014_s10] sm:$0xff] }
  0x35   : > { %1230 = vmatpush1.bf16.msra.mxu0 %v3194_v5  ;;  %1303 = vmatpush1.bf16.msra.mxu1 %v3196_v6  ;;  %v3261_v1 = vcombine.high %v470_v60, %v474_v61  ;;  %v467_v5 = vld [vmem:[%s5260_s1 + $0x1f0] sm:$0xff]  ;;  %v464_v6 = vld [vmem:[%s5260_s1 + $0x1d8] sm:$0xff]  ;;  %v3260_v10 = vcombine.low %v470_v60, %v474_v61  ;;  %v386_v17 = vld [vmem:[%s4014_s10 + $0x28] sm:$0xff] }
  0x36   : > { %1231 = vmatprep.subr.bf16.mxu0 %v3315_v7  ;;  %1304 = vmatprep.subr.bf16.mxu1 %v3317_v8  ;;  %v468_v7 = vld [vmem:[%s5260_s1 + $0x1f8] sm:$0xff]  ;;  %v3258_v8 = vcombine.low %v469_v57, %v473_v59  ;;  %v3255_v11 = vcombine.high %v463_v4, %v467_v5  ;;  %v3254_v19 = vcombine.low %v463_v4, %v467_v5  ;;  %v385_v28 = vld [vmem:[%s4014_s10 + $0x20] sm:$0xff] }
  0x37   : > { %v3256_v20 = vcombine.low %v464_v6, %v468_v7  ;;  %v4175_v26 = vpack.c.bf16 %v388_v18, %v386_v17  ;;  %v389_v50 = vld [vmem:[%s4014_s10 + $0x40] sm:$0xff]  ;;  %v424_v59 = vld [vmem:[%s5260_s1 + $0x98] sm:$0xff] }
  0x38   : > { %v428_v60 = vld [vmem:[%s5260_s1 + $0xb8] sm:$0xff] }
  0x39   : > { %1232 = vmatpush2.bf16.msra.mxu0 %v3314_v13  ;;  %1305 = vmatpush2.bf16.msra.mxu1 %v3316_v14  ;;  %v3257_v13 = vcombine.high %v464_v6, %v468_v7  ;;  %v456_v14 = vld [vmem:[%s5260_s1 + $0x198] sm:$0xff]  ;;  %v3217_v6 = vcombine.high %v424_v59, %v428_v60 }
  0x3a   : > { %1233 = vmatprep.subr.bf16.mxu0 %v3307_v15  ;;  %1306 = vmatprep.subr.bf16.mxu1 %v3309_v16  ;;  %v460_v15 = vld [vmem:[%s5260_s1 + $0x1b8] sm:$0xff]  ;;  %v4162_v16 = vpack.c.bf16 %v383_v3, %v381_v2  ;;  %v419_v2 = vld [vmem:[%s5260_s1 + $0x70] sm:$0xff] }
  0x3b   : > { %v416_v5 = vld [vmem:[%s5260_s1 + $0x58] sm:$0xff] }
  0x3c   : > { %v420_v7 = vld [vmem:[%s5260_s1 + $0x78] sm:$0xff] }
  0x3d   : > { %1234 = vmatpush2.bf16.msra.mxu0 %v3306_v21  ;;  %1307 = vmatpush2.bf16.msra.mxu1 %v3308_v22  ;;  %v3247_v21 = vcombine.high %v455_v9, %v459_v12  ;;  %v447_v22 = vld [vmem:[%s5260_s1 + $0x150] sm:$0xff]  ;;  %v408_v17 = vld [vmem:[%s5260_s1 + $0x18] sm:$0xff] }
  0x3e   : > { %1235 = vmatprep.subr.bf16.mxu0 %v3299_v23  ;;  %1308 = vmatprep.subr.bf16.mxu1 %v3301_v24  ;;  %v3249_v23 = vcombine.high %v456_v14, %v460_v15  ;;  %v451_v24 = vld [vmem:[%s5260_s1 + $0x170] sm:$0xff]  ;;  %v412_v18 = vld [vmem:[%s5260_s1 + $0x38] sm:$0xff] }
  0x3f   : > { %v3239_v33 = vcombine.high %v447_v22, %v451_v24  ;;  %v3238_v41 = vcombine.low %v447_v22, %v451_v24  ;;  %v527_v22 = vld [vmem:[%s5260_s1 + $0x3d0] sm:$0xff]  ;;  %v3208_v24 = vcombine.low %v416_v5, %v420_v7 }
  0x41   : > { %1236 = vmatpush2.bf16.msra.mxu0 %v3298_v29  ;;  %1309 = vmatpush2.bf16.msra.mxu1 %v3300_v30  ;;  %v3246_v29 = vcombine.low %v455_v9, %v459_v12  ;;  %v439_v30 = vld [vmem:[%s5260_s1 + $0x110] sm:$0xff]  ;;  %v393_v9 = vld [vmem:[%s4014_s10 + $0x60] sm:$0xff] }
  0x42   : > { %1237 = vmatprep.subr.bf16.mxu0 %v3291_v31  ;;  %1310 = vmatprep.subr.bf16.mxu1 %v3293_v32  ;;  %v387_v31 = vld [vmem:[%s4014_s10 + $0x30] sm:$0xff]  ;;  %v3248_v32 = vcombine.low %v456_v14, %v460_v15  ;;  %v3231_v43 = vcombine.high %v439_v30, %v443_v34  ;;  %v3230_v51 = vcombine.low %v439_v30, %v443_v34 }
  0x43   : > { %v407_v12 = vld [vmem:[%s5260_s1 + $0x10] sm:$0xff]  ;;  %v3216_v14 = vcombine.low %v424_v59, %v428_v60 }
  0x45   : > { %1238 = vmatpush2.bf16.msra.mxu0 %v3290_v37  ;;  %1311 = vmatpush2.bf16.msra.mxu1 %v3292_v38  ;;  %v444_v37 = vld [vmem:[%s5260_s1 + $0x138] sm:$0xff]  ;;  %v4198_v38 = vpack.c.bf16 %v387_v31, %v385_v28  ;;  %v519_v31 = vld [vmem:[%s5260_s1 + $0x390] sm:$0xff] }
  0x46   : > { %1239 = vmatprep.subr.bf16.mxu0 %v3283_v39  ;;  %1312 = vmatprep.subr.bf16.mxu1 %v3285_v40  ;;  %v390_v39 = vld [vmem:[%s4014_s10 + $0x48] sm:$0xff]  ;;  %v392_v40 = vld [vmem:[%s4014_s10 + $0x58] sm:$0xff] }
  0x47   : > { %v532_v28 = vld [vmem:[%s5260_s1 + $0x3f8] sm:$0xff] }
  0x49   : > { %1240 = vmatpush2.bf16.msra.mxu0 %v3282_v45  ;;  %1313 = vmatpush2.bf16.msra.mxu1 %v3284_v46  ;;  %v3233_v45 = vcombine.high %v440_v36, %v444_v37  ;;  %v435_v46 = vld [vmem:[%s5260_s1 + $0xf0] sm:$0xff] }
  0x4a   : > { %1241 = vmatprep.subr.bf16.mxu0 %v3275_v47  ;;  %1314 = vmatprep.subr.bf16.mxu1 %v3277_v48  ;;  %v432_v47 = vld [vmem:[%s5260_s1 + $0xd8] sm:$0xff]  ;;  %v4211_v48 = vpack.c.bf16 %v392_v40, %v390_v39  ;;  %v511_v40 = vld [vmem:[%s5260_s1 + $0x350] sm:$0xff] }
  0x4b   : > { %v3225_v57 = vcombine.high %v432_v47, %v436_v49  ;;  %v3224_v3 = vcombine.low %v432_v47, %v436_v49  ;;  %v503_v47 = vld [vmem:[%s5260_s1 + $0x310] sm:$0xff] }
  0x4c   : > { %v507_v49 = vld [vmem:[%s5260_s1 + $0x330] sm:$0xff] }
  0x4d   : > { %1242 = vmatpush2.bf16.msra.mxu0 %v3274_v53  ;;  %1315 = vmatpush2.bf16.msra.mxu1 %v3276_v54  ;;  %v391_v53 = vld [vmem:[%s4014_s10 + $0x50] sm:$0xff]  ;;  %v3232_v54 = vcombine.low %v440_v36, %v444_v37  ;;  %v524_v36 = vld [vmem:[%s5260_s1 + $0x3b8] sm:$0xff]  ;;  %v3321_v37 = vcombine.high %v528_v27, %v532_v28  ;;  %v3295_v60 = vcombine.high %v503_v47, %v507_v49 }
  0x4e   : > { %1243 = vmatprep.subr.bf16.mxu0 %v3267_v55  ;;  %1316 = vmatprep.subr.bf16.mxu1 %v3269_v56  ;;  %v3223_v55 = vcombine.high %v431_v44, %v435_v46  ;;  %v427_v56 = vld [vmem:[%s5260_s1 + $0xb0] sm:$0xff]  ;;  %v4234_v61 = vpack.c.bf16 %v391_v53, %v389_v50  ;;  %v508_v53 = vld [vmem:[%s5260_s1 + $0x338] sm:$0xff] }
  0x4f   : > { %v3215_v4 = vcombine.high %v423_v52, %v427_v56 }
  0x51   : > { %1244 = vmatpush2.bf16.msra.mxu0 %v3266_v62  ;;  %1317 = vmatpush2.bf16.msra.mxu1 %v3268_v63  ;;  %v394_v62 = vld [vmem:[%s4014_s10 + $0x68] sm:$0xff]  ;;  %v396_v63 = vld [vmem:[%s4014_s10 + $0x78] sm:$0xff] }
  0x52   : > { %1245 = vmatprep.subr.bf16.mxu0 %v3259_v0  ;;  %1318 = vmatprep.subr.bf16.mxu1 %v3261_v1  ;;  %v3222_v0 = vcombine.low %v431_v44, %v435_v46  ;;  %v415_v1 = vld [vmem:[%s5260_s1 + $0x50] sm:$0xff]  ;;  %v512_v44 = vld [vmem:[%s5260_s1 + $0x358] sm:$0xff] }
  0x53   : > { %v3207_v15 = vcombine.high %v415_v1, %v419_v2 }
  0x55   : > { %1246 = vmatpush2.bf16.msra.mxu0 %v3258_v8  ;;  %1319 = vmatpush2.bf16.msra.mxu1 %v3260_v10  ;;  %v4250_v8 = vpack.c.bf16 %v396_v63, %v394_v62  ;;  %v395_v10 = vld [vmem:[%s4014_s10 + $0x70] sm:$0xff]  ;;  %v496_v62 = vld [vmem:[%s5260_s1 + $0x2d8] sm:$0xff] }
  0x56   : > { %1361 = vmatprep.subr.bf16.mxu0 %v3255_v11  ;;  %1434 = vmatprep.subr.bf16.mxu1 %v3257_v13  ;;  %v3214_v11 = vcombine.low %v423_v52, %v427_v56  ;;  %v411_v13 = vld [vmem:[%s5260_s1 + $0x30] sm:$0xff]  ;;  %v504_v52 = vld [vmem:[%s5260_s1 + $0x318] sm:$0xff] }
  0x57   : > { %v3199_v25 = vcombine.high %v407_v12, %v411_v13  ;;  %v3198_v30 = vcombine.low %v407_v12, %v411_v13  ;;  %v495_v56 = vld [vmem:[%s5260_s1 + $0x2d0] sm:$0xff]  ;;  %v500_v63 = vld [vmem:[%s5260_s1 + $0x2f8] sm:$0xff] }
  0x58   : > { %1248 = vmatmul.mubr.bf16.vlgmr.msra.gmra.mxu0 %v4162_v16  ;;  %1321 = vmatmul.mubr.bf16.vlgmr.msra.gmra.mxu1 %v4162_v16 }
  0x59   : > { %1362 = vmatpush1.bf16.msra.mxu0 %v3254_v19  ;;  %1435 = vmatpush1.bf16.msra.mxu1 %v3256_v20  ;;  %v3209_v19 = vcombine.high %v416_v5, %v420_v7  ;;  %v4270_v20 = vpack.c.bf16 %v395_v10, %v393_v9  ;;  %v487_v5 = vld [vmem:[%s5260_s1 + $0x290] sm:$0xff]  ;;  %v488_v7 = vld [vmem:[%s5260_s1 + $0x298] sm:$0xff] }
  0x5a   : > { %1363 = vmatprep.subr.bf16.mxu0 %v3247_v21  ;;  %1436 = vmatprep.subr.bf16.mxu1 %v3249_v23  ;;  %v3206_v21 = vcombine.low %v415_v1, %v419_v2  ;;  %v531_v23 = vld [vmem:[%s5260_s1 + $0x3f0] sm:$0xff]  ;;  %v3294_v1 = vcombine.low %v503_v47, %v507_v49  ;;  %v3296_v2 = vcombine.low %v504_v52, %v508_v53  ;;  %v492_v9 = vld [vmem:[%s5260_s1 + $0x2b8] sm:$0xff]  ;;  %v3534_v47 = vld [vmem:[%s5262_s3 + $0x40] ss:$8 sps:$4 sm:$0xff]  }
  0x5b   : > { %1257 = vmatprep.mubr.bf16.mxu0 %v4175_v26  ;;  %1330 = vmatprep.mubr.bf16.mxu1 %v4175_v26  ;;  %v3319_v34 = vcombine.high %v527_v22, %v531_v23  ;;  %v3318_v39 = vcombine.low %v527_v22, %v531_v23  ;;  %v3281_v13 = vcombine.high %v488_v7, %v492_v9  ;;  %v3537_v49 = vld [vmem:[%s5262_s3 + $0x140] ss:$8 sps:$4 sm:$0xff]  }
  0x5d   : > { %1364 = vmatpush1.bf16.msra.mxu0 %v3246_v29  ;;  %1437 = vmatpush1.bf16.msra.mxu1 %v3248_v32  ;;  %v3201_v29 = vcombine.high %v408_v17, %v412_v18  ;;  %v523_v32 = vld [vmem:[%s5260_s1 + $0x3b0] sm:$0xff] }
  0x5e   : > { %1365 = vmatprep.subr.bf16.mxu0 %v3239_v33  ;;  %1438 = vmatprep.subr.bf16.mxu1 %v3241_v35  ;;  %v3200_v33 = vcombine.low %v408_v17, %v412_v18  ;;  %v520_v35 = vld [vmem:[%s5260_s1 + $0x398] sm:$0xff]  ;;  %v3310_v46 = vcombine.low %v519_v31, %v523_v32 }
  0x5f   : > { %v3312_v50 = vcombine.low %v520_v35, %v524_v36  ;;  %v480_v17 = vld [vmem:[%s5260_s1 + $0x258] sm:$0xff] }
  0x60   : > { %1258 = vmatmul.mubr.bf16.gmra.mxu0 %v4198_v38  ;;  %1331 = vmatmul.mubr.bf16.gmra.mxu1 %v4198_v38  ;;  %v484_v18 = vld [vmem:[%s5260_s1 + $0x278] sm:$0xff] }
  0x61   : > { %1366 = vmatpush1.bf16.msra.mxu0 %v3238_v41  ;;  %1439 = vmatpush1.bf16.msra.mxu1 %v3240_v42  ;;  %v515_v41 = vld [vmem:[%s5260_s1 + $0x370] sm:$0xff]  ;;  %v3320_v42 = vcombine.low %v528_v27, %v532_v28  ;;  %v3273_v23 = vcombine.high %v480_v17, %v484_v18  ;;  %v472_v27 = vld [vmem:[%s5260_s1 + $0x218] sm:$0xff] }
  0x62   : > { %1367 = vmatprep.subr.bf16.mxu0 %v3231_v43  ;;  %1440 = vmatprep.subr.bf16.mxu1 %v3233_v45  ;;  %v3311_v43 = vcombine.high %v519_v31, %v523_v32  ;;  %v3313_v45 = vcombine.high %v520_v35, %v524_v36  ;;  %v476_v28 = vld [vmem:[%s5260_s1 + $0x238] sm:$0xff] }
  0x63   : > { %1267 = vmatprep.mubr.bf16.mxu0 %v4211_v48  ;;  %1340 = vmatprep.mubr.bf16.mxu1 %v4211_v48  ;;  %v3265_v32 = vcombine.high %v472_v27, %v476_v28  ;;  %v3518_v35 = vld [vmem:[%s5262_s3 + $0x74] ss:$8 sps:$4 sm:$0xff]  }
  0x64   : > { %v3521_v36 = vld [vmem:[%s5262_s3 + $0x174] ss:$8 sps:$4 sm:$0xff]  }
  0x65   : > { %1368 = vmatpush1.bf16.msra.mxu0 %v3230_v51  ;;  %1441 = vmatpush1.bf16.msra.mxu1 %v3232_v54  ;;  %v3303_v51 = vcombine.high %v511_v40, %v515_v41 }
  0x66   : > { %1369 = vmatprep.subr.bf16.mxu0 %v3223_v55  ;;  %1442 = vmatprep.subr.bf16.mxu1 %v3225_v57  ;;  %v3302_v55 = vcombine.low %v511_v40, %v515_v41  ;;  %v499_v57 = vld [vmem:[%s5260_s1 + $0x2f0] sm:$0xff]  ;;  %v3524_v40 = vld [vmem:[%s5262_s3 + $0x64] ss:$8 sps:$4 sm:$0xff]  }
  0x67   : > { %v3286_v10 = vcombine.low %v495_v56, %v499_v57  ;;  %v3527_v41 = vld [vmem:[%s5262_s3 + $0x164] ss:$8 sps:$4 sm:$0xff]  }
  0x68   : > { %1268 = vmatmul.mubr.bf16.gmra.mxu0 %v4234_v61  ;;  %1341 = vmatmul.mubr.bf16.gmra.mxu1 %v4234_v61 }
  0x69   : > { %1370 = vmatpush1.bf16.msra.mxu0 %v3222_v0  ;;  %1443 = vmatpush1.bf16.msra.mxu1 %v3224_v3  ;;  %v3297_v0 = vcombine.high %v504_v52, %v508_v53  ;;  %v3287_v3 = vcombine.high %v495_v56, %v499_v57  ;;  %v3548_v52 = vld [vmem:[%s5262_s3 + $0x24] ss:$8 sps:$4 sm:$0xff]   ;;  %v3554_v56 = vld [vmem:[%s5262_s3 + $0x14] ss:$8 sps:$4 sm:$0xff]   ;;  %v3555_v57 = vld [vmem:[%s5262_s3 + $0x110] ss:$8 sps:$4 sm:$0xff]  }
  0x6a   : > { %1371 = vmatprep.subr.bf16.mxu0 %v3215_v4  ;;  %1444 = vmatprep.subr.bf16.mxu1 %v3217_v6  ;;  %v3289_v4 = vcombine.high %v496_v62, %v500_v63  ;;  %v491_v6 = vld [vmem:[%s5260_s1 + $0x2b0] sm:$0xff]  ;;  %v3551_v53 = vld [vmem:[%s5262_s3 + $0x124] ss:$8 sps:$4 sm:$0xff]  }
  0x6b   : > { %1277 = vmatprep.mubr.bf16.mxu0 %v4250_v8  ;;  %1350 = vmatprep.mubr.bf16.mxu1 %v4250_v8  ;;  %v3279_v12 = vcombine.high %v487_v5, %v491_v6 }
  0x6d   : > { %1372 = vmatpush1.bf16.msra.mxu0 %v3214_v11  ;;  %1445 = vmatpush1.bf16.msra.mxu1 %v3216_v14  ;;  %v3288_v11 = vcombine.low %v496_v62, %v500_v63  ;;  %v479_v14 = vld [vmem:[%s5260_s1 + $0x250] sm:$0xff]  ;;  %v3558_v62 = vld [vmem:[%s5262_s3] ss:$8 sps:$4 sm:$0xff]  }
  0x6e   : > { %1373 = vmatprep.subr.bf16.mxu0 %v3207_v15  ;;  %1446 = vmatprep.subr.bf16.mxu1 %v3209_v19  ;;  %v483_v15 = vld [vmem:[%s5260_s1 + $0x270] sm:$0xff]  ;;  %v3278_v19 = vcombine.low %v487_v5, %v491_v6  ;;  %v3561_v63 = vld [vmem:[%s5262_s3 + $0x100] ss:$8 sps:$4 sm:$0xff]  }
  0x6f   : > { %v3271_v22 = vcombine.high %v479_v14, %v483_v15  ;;  %v3570_v5 = vld [vmem:[%s5262_s3 + $0xe0] ss:$8 sps:$4 sm:$0xff]  }
  0x70   : > { %1278 = vmatmul.mubr.bf16.gmra.mxu0 %v4270_v20  ;;  %1351 = vmatmul.mubr.bf16.gmra.mxu1 %v4270_v20  ;;  %v3573_v6 = vld [vmem:[%s5262_s3 + $0x1e0] ss:$8 sps:$4 sm:$0xff]  }
  0x71   : > { %1374 = vmatpush1.bf16.msra.mxu0 %v3206_v21  ;;  %1447 = vmatpush1.bf16.msra.mxu1 %v3208_v24  ;;  %v3280_v21 = vcombine.low %v488_v7, %v492_v9  ;;  %v471_v24 = vld [vmem:[%s5260_s1 + $0x210] sm:$0xff] }
  0x72   : > { %1375 = vmatprep.subr.bf16.mxu0 %v3199_v25  ;;  %1448 = vmatprep.subr.bf16.mxu1 %v3201_v29  ;;  %v475_v25 = vld [vmem:[%s5260_s1 + $0x230] sm:$0xff]  ;;  %v3270_v29 = vcombine.low %v479_v14, %v483_v15  ;;  %v3582_v14 = vld [vmem:[%s5262_s3 + $0xc0] ss:$8 sps:$4 sm:$0xff]  }
  0x73   : > { %1393 = vmatprep.mubr.bf16.mxu0 %v4030_v58  ;;  %1466 = vmatprep.mubr.bf16.mxu1 %v4030_v58  ;;  %v516_v58 = vld [vmem:[%s5260_s1 + $0x378] sm:$0xff]  ;;  %v3263_v31 = vcombine.high %v471_v24, %v475_v25  ;;  %v3585_v15 = vld [vmem:[%s5262_s3 + $0x1c0] ss:$8 sps:$4 sm:$0xff]  }
  0x74   : > { %v3305_v54 = vcombine.high %v512_v44, %v516_v58  ;;  %v3304_v59 = vcombine.low %v512_v44, %v516_v58  ;;  %v3530_v44 = vld [vmem:[%s5262_s3 + $0x54] ss:$8 sps:$4 sm:$0xff]   ;;  %v3531_v58 = vld [vmem:[%s5262_s3 + $0x150] ss:$8 sps:$4 sm:$0xff]  }
  0x75   : > { %1376 = vmatpush1.bf16.msra.mxu0 %v3198_v30  ;;  %1449 = vmatpush1.bf16.msra.mxu1 %v3200_v33  ;;  %v3272_v30 = vcombine.low %v480_v17, %v484_v18  ;;  %v3262_v33 = vcombine.low %v471_v24, %v475_v25  ;;  %v3578_v7 = vld [vmem:[%s5262_s3 + $0xd4] ss:$8 sps:$4 sm:$0xff]   ;;  %v3594_v24 = vld [vmem:[%s5262_s3 + $0xa0] ss:$8 sps:$4 sm:$0xff]  }
  0x76   : > { %1377 = vmatprep.subr.bf16.mxu0 %v3319_v34  ;;  %1450 = vmatprep.subr.bf16.mxu1 %v3321_v37  ;;  %v3264_v34 = vcombine.low %v472_v27, %v476_v28  ;;  %v3516_v37 = vld [vmem:[%s5262_s3 + $0x70] ss:$8 sps:$4 sm:$0xff]   ;;  %v3581_v9 = vld [vmem:[%s5262_s3 + $0x1d4] ss:$8 sps:$4 sm:$0xff]   ;;  %v3597_v25 = vld [vmem:[%s5262_s3 + $0x1a0] ss:$8 sps:$4 sm:$0xff]  }
  0x77   : > { %v3590_v17 = vld [vmem:[%s5262_s3 + $0xb4] ss:$8 sps:$4 sm:$0xff]  }
  0x78   : > { %v3593_v18 = vld [vmem:[%s5262_s3 + $0x1b4] ss:$8 sps:$4 sm:$0xff]  }
  0x79   : > { %1378 = vmatpush2.bf16.msra.mxu0 %v3318_v39  ;;  %1451 = vmatpush2.bf16.msra.mxu1 %v3320_v42  ;;  %v3519_v39 = vld [vmem:[%s5262_s3 + $0x170] ss:$8 sps:$4 sm:$0xff]   ;;  %v3522_v42 = vld [vmem:[%s5262_s3 + $0x60] ss:$8 sps:$4 sm:$0xff]   ;;  %v3602_v27 = vld [vmem:[%s5262_s3 + $0x94] ss:$8 sps:$4 sm:$0xff]  }
  0x7a   : > { %1379 = vmatprep.subr.bf16.mxu0 %v3311_v43  ;;  %1452 = vmatprep.subr.bf16.mxu1 %v3313_v45  ;;  %v3525_v43 = vld [vmem:[%s5262_s3 + $0x160] ss:$8 sps:$4 sm:$0xff]   ;;  %v3536_v45 = vld [vmem:[%s5262_s3 + $0x44] ss:$8 sps:$4 sm:$0xff]   ;;  %v3605_v28 = vld [vmem:[%s5262_s3 + $0x194] ss:$8 sps:$4 sm:$0xff]  }
  0x7d   : > { %1380 = vmatpush2.bf16.msra.mxu0 %v3310_v46  ;;  %1453 = vmatpush2.bf16.msra.mxu1 %v3312_v50  ;;  %v3539_v46 = vld [vmem:[%s5262_s3 + $0x144] ss:$8 sps:$4 sm:$0xff]   ;;  %v3542_v50 = vld [vmem:[%s5262_s3 + $0x34] ss:$8 sps:$4 sm:$0xff]  }
  0x7e   : > { %1381 = vmatprep.subr.bf16.mxu0 %v3303_v51  ;;  %1454 = vmatprep.subr.bf16.mxu1 %v3305_v54  ;;  %v3543_v51 = vld [vmem:[%s5262_s3 + $0x130] ss:$8 sps:$4 sm:$0xff]   ;;  %v3546_v54 = vld [vmem:[%s5262_s3 + $0x20] ss:$8 sps:$4 sm:$0xff]  }
  0x81   : > { %1382 = vmatpush2.bf16.msra.mxu0 %v3302_v55  ;;  %1455 = vmatpush2.bf16.msra.mxu1 %v3304_v59  ;;  %v3549_v55 = vld [vmem:[%s5262_s3 + $0x120] ss:$8 sps:$4 sm:$0xff]   ;;  %v3560_v59 = vld [vmem:[%s5262_s3 + $0x4] ss:$8 sps:$4 sm:$0xff]  }
  0x82   : > { %1383 = vmatprep.subr.bf16.mxu0 %v3295_v60  ;;  %1456 = vmatprep.subr.bf16.mxu1 %v3297_v0  ;;  %v3563_v60 = vld [vmem:[%s5262_s3 + $0x104] ss:$8 sps:$4 sm:$0xff]   ;;  %v3566_v0 = vld [vmem:[%s5262_s3 + $0xf4] ss:$8 sps:$4 sm:$0xff]  }
  0x85   : > { %1384 = vmatpush2.bf16.msra.mxu0 %v3294_v1  ;;  %1457 = vmatpush2.bf16.msra.mxu1 %v3296_v2  ;;  %v3564_v1 = vld [vmem:[%s5262_s3 + $0xf0] ss:$8 sps:$4 sm:$0xff]  }
  0x86   : > { %1385 = vmatprep.subr.bf16.mxu0 %v3287_v3  ;;  %1458 = vmatprep.subr.bf16.mxu1 %v3289_v4  ;;  %v3567_v2 = vld [vmem:[%s5262_s3 + $0x1f0] ss:$8 sps:$4 sm:$0xff]   ;;  %v3572_v3 = vld [vmem:[%s5262_s3 + $0xe4] ss:$8 sps:$4 sm:$0xff]  }
  0x87   : > { %v3575_v4 = vld [vmem:[%s5262_s3 + $0x1e4] ss:$8 sps:$4 sm:$0xff]  }
  0x89   : > { %1386 = vmatpush2.bf16.msra.mxu0 %v3286_v10  ;;  %1459 = vmatpush2.bf16.msra.mxu1 %v3288_v11  ;;  %v3576_v10 = vld [vmem:[%s5262_s3 + $0xd0] ss:$8 sps:$4 sm:$0xff]  }
  0x8a   : > { %1387 = vmatprep.subr.bf16.mxu0 %v3279_v12  ;;  %1460 = vmatprep.subr.bf16.mxu1 %v3281_v13  ;;  %v3579_v11 = vld [vmem:[%s5262_s3 + $0x1d0] ss:$8 sps:$4 sm:$0xff]   ;;  %v3584_v12 = vld [vmem:[%s5262_s3 + $0xc4] ss:$8 sps:$4 sm:$0xff]  }
  0x8b   : > { %v3587_v13 = vld [vmem:[%s5262_s3 + $0x1c4] ss:$8 sps:$4 sm:$0xff]  }
  0x8d   : > { %1388 = vmatpush2.bf16.msra.mxu0 %v3278_v19  ;;  %1461 = vmatpush2.bf16.msra.mxu1 %v3280_v21  ;;  %v3588_v19 = vld [vmem:[%s5262_s3 + $0xb0] ss:$8 sps:$4 sm:$0xff]  }
  0x8e   : > { %1389 = vmatprep.subr.bf16.mxu0 %v3271_v22  ;;  %1462 = vmatprep.subr.bf16.mxu1 %v3273_v23  ;;  %v3591_v21 = vld [vmem:[%s5262_s3 + $0x1b0] ss:$8 sps:$4 sm:$0xff]   ;;  %v3596_v22 = vld [vmem:[%s5262_s3 + $0xa4] ss:$8 sps:$4 sm:$0xff]  }
  0x8f   : > { %v3599_v23 = vld [vmem:[%s5262_s3 + $0x1a4] ss:$8 sps:$4 sm:$0xff]  }
  0x91   : > { %1390 = vmatpush2.bf16.msra.mxu0 %v3270_v29  ;;  %1463 = vmatpush2.bf16.msra.mxu1 %v3272_v30  ;;  %v3600_v29 = vld [vmem:[%s5262_s3 + $0x90] ss:$8 sps:$4 sm:$0xff]  }
  0x92   : > { %1391 = vmatprep.subr.bf16.mxu0 %v3263_v31  ;;  %1464 = vmatprep.subr.bf16.mxu1 %v3265_v32  ;;  %v3603_v30 = vld [vmem:[%s5262_s3 + $0x190] ss:$8 sps:$4 sm:$0xff]   ;;  %v3608_v31 = vld [vmem:[%s5262_s3 + $0x84] ss:$8 sps:$4 sm:$0xff]  }
  0x93   : > { %v3611_v32 = vld [vmem:[%s5262_s3 + $0x184] ss:$8 sps:$4 sm:$0xff]  }
  0x95   : > { %1392 = vmatpush2.bf16.msra.mxu0 %v3262_v33  ;;  %1465 = vmatpush2.bf16.msra.mxu1 %v3264_v34  ;;  %v3606_v33 = vld [vmem:[%s5262_s3 + $0x80] ss:$8 sps:$4 sm:$0xff]  }
  0x96   : > { %2387 = vmatprep.subr.bf16.mxu0 %v3518_v35  ;;  %2460 = vmatprep.subr.bf16.mxu1 %v3521_v36  ;;  %v3609_v34 = vld [vmem:[%s5262_s3 + $0x180] ss:$8 sps:$4 sm:$0xff]   ;;  %v3614_v35 = vld [vmem:[%s5262_s3 + $0x274] ss:$8 sps:$4 sm:$0xff]  }
  0x97   : > { %v3617_v36 = vld [vmem:[%s5262_s3 + $0x374] ss:$8 sps:$4 sm:$0xff]  }
  0x98   : > { %1394 = vmatmul.mubr.bf16.vlgmr.msra.gmra.mxu0 %v4162_v16  ;;  %1467 = vmatmul.mubr.bf16.vlgmr.msra.gmra.mxu1 %v4162_v16  ;;  %v3533_v16 = vld [vmem:[%s5262_s3 + $0x154] ss:$8 sps:$4 sm:$0xff]  }
  0x99   : > { %1403 = vmatprep.mubr.bf16.mxu0 %v4175_v26  ;;  %1476 = vmatprep.mubr.bf16.mxu1 %v4175_v26  ;;  %v3528_v26 = vld [vmem:[%s5262_s3 + $0x50] ss:$8 sps:$4 sm:$0xff]  }
  0x9a   : > { %2388 = vmatpush1.bf16.msra.mxu0 %v3516_v37  ;;  %2461 = vmatpush1.bf16.msra.mxu1 %v3519_v39  ;;  %v535_v37 = vlaneseq }
  0x9b   : > { %2389 = vmatprep.subr.bf16.mxu0 %v3524_v40  ;;  %2462 = vmatprep.subr.bf16.mxu1 %v3527_v41 }
  0x9c   : > { %v4584_v39 = vshrl.u32 %v535_v37, 7  ;;  %v3626_v37 = vld [vmem:[%s5262_s3 + $0x254] ss:$8 sps:$4 sm:$0xff]  }
  0x9e   : > { %2390 = vmatpush1.bf16.msra.mxu0 %v3522_v42  ;;  %2463 = vmatpush1.bf16.msra.mxu1 %v3525_v43  ;;  %v545_v40 = vsub.s32 2, %v4584_v39  ;;  %v4588_v41 = vsub.s32 1, %v4584_v39  ;;  %v4593_v42 = vld [vmem:[%s5261_s2] sm:$0xff]  ;;  %v4596_v43 = vsub.s32 0, %v4584_v39 }
  0x9f   : > { %2391 = vmatprep.subr.bf16.mxu0 %v3530_v44  ;;  %2464 = vmatprep.subr.bf16.mxu1 %v3533_v16  ;;  %v549_v44 = vsub.s32 3, %v4584_v39 }
  0xa0   : > { %1404 = vmatmul.mubr.bf16.gmra.mxu0 %v4198_v38  ;;  %1477 = vmatmul.mubr.bf16.gmra.mxu1 %v4198_v38  ;;  %v3545_v38 = vld [vmem:[%s5262_s3 + $0x134] ss:$8 sps:$4 sm:$0xff]  }
  0xa1   : > { %1413 = vmatprep.mubr.bf16.mxu0 %v4211_v48  ;;  %1486 = vmatprep.mubr.bf16.mxu1 %v4211_v48  ;;  %v3540_v48 = vld [vmem:[%s5262_s3 + $0x30] ss:$8 sps:$4 sm:$0xff]  }
  0xa2   : > { %2392 = vmatpush1.bf16.msra.mxu0 %v3528_v26  ;;  %2465 = vmatpush1.bf16.msra.mxu1 %v3531_v58  ;;  %v4600_v26 = vrot.slane %v4593_v42, %v545_v40 }
  0xa3   : > { %2393 = vmatprep.subr.bf16.mxu0 %v3536_v45  ;;  %2466 = vmatprep.subr.bf16.mxu1 %v3539_v46  ;;  %v4604_v45 = vrot.slane %v4593_v42, %v4588_v41  ;;  %v4608_v46 = vrot.slane %v4593_v42, %v4596_v43 }
  0xa6   : > { %2394 = vmatpush1.bf16.msra.mxu0 %v3534_v47  ;;  %2467 = vmatpush1.bf16.msra.mxu1 %v3537_v49  ;;  %v4611_v49 = vrot.slane %v4593_v42, %v549_v44 }
  0xa7   : > { %2395 = vmatprep.subr.bf16.mxu0 %v3542_v50  ;;  %2468 = vmatprep.subr.bf16.mxu1 %v3545_v38 }
  0xa8   : > { %1414 = vmatmul.mubr.bf16.gmra.mxu0 %v4234_v61  ;;  %1487 = vmatmul.mubr.bf16.gmra.mxu1 %v4234_v61  ;;  %v3557_v61 = vld [vmem:[%s5262_s3 + $0x114] ss:$8 sps:$4 sm:$0xff]  }
  0xa9   : > { %1423 = vmatprep.mubr.bf16.mxu0 %v4250_v8  ;;  %1496 = vmatprep.mubr.bf16.mxu1 %v4250_v8  ;;  %v3552_v8 = vld [vmem:[%s5262_s3 + $0x10] ss:$8 sps:$4 sm:$0xff]  }
  0xaa   : > { %2396 = vmatpush1.bf16.msra.mxu0 %v3540_v48  ;;  %2469 = vmatpush1.bf16.msra.mxu1 %v3543_v51 }
  0xab   : > { %2397 = vmatprep.subr.bf16.mxu0 %v3548_v52  ;;  %2470 = vmatprep.subr.bf16.mxu1 %v3551_v53 }
  0xae   : > { %2398 = vmatpush1.bf16.msra.mxu0 %v3546_v54  ;;  %2471 = vmatpush1.bf16.msra.mxu1 %v3549_v55 }
  0xaf   : > { %2399 = vmatprep.subr.bf16.mxu0 %v3554_v56  ;;  %2472 = vmatprep.subr.bf16.mxu1 %v3557_v61 }
  0xb0   : > { %1424 = vmatmul.mubr.bf16.gmra.mxu0 %v4270_v20  ;;  %1497 = vmatmul.mubr.bf16.gmra.mxu1 %v4270_v20  ;;  %v3569_v20 = vld [vmem:[%s5262_s3 + $0x1f4] ss:$8 sps:$4 sm:$0xff]  }
  0xb2   : > { %2400 = vmatpush1.bf16.msra.mxu0 %v3552_v8  ;;  %2473 = vmatpush1.bf16.msra.mxu1 %v3555_v57 }
  0xb3   : > { %2401 = vmatprep.subr.bf16.mxu0 %v3560_v59  ;;  %2474 = vmatprep.subr.bf16.mxu1 %v3563_v60 }
  0xb6   : > { %2402 = vmatpush1.bf16.msra.mxu0 %v3558_v62  ;;  %2475 = vmatpush1.bf16.msra.mxu1 %v3561_v63 }
  0xb7   : > { %2403 = vmatprep.subr.bf16.mxu0 %v3566_v0  ;;  %2476 = vmatprep.subr.bf16.mxu1 %v3569_v20 }
  0xba   : > { %2404 = vmatpush2.bf16.msra.mxu0 %v3564_v1  ;;  %2477 = vmatpush2.bf16.msra.mxu1 %v3567_v2 }
  0xbb   : > { %2405 = vmatprep.subr.bf16.mxu0 %v3572_v3  ;;  %2478 = vmatprep.subr.bf16.mxu1 %v3575_v4 }
  0xbe   : > { %2406 = vmatpush2.bf16.msra.mxu0 %v3570_v5  ;;  %2479 = vmatpush2.bf16.msra.mxu1 %v3573_v6 }
  0xbf   : > { %2407 = vmatprep.subr.bf16.mxu0 %v3578_v7  ;;  %2480 = vmatprep.subr.bf16.mxu1 %v3581_v9 }
  0xc2   : > { %2408 = vmatpush2.bf16.msra.mxu0 %v3576_v10  ;;  %2481 = vmatpush2.bf16.msra.mxu1 %v3579_v11  ;;  %v3612_v10 = vld [vmem:[%s5262_s3 + $0x270] ss:$8 sps:$4 sm:$0xff]  }
  0xc3   : > { %2409 = vmatprep.subr.bf16.mxu0 %v3584_v12  ;;  %2482 = vmatprep.subr.bf16.mxu1 %v3587_v13 }
  0xc6   : > { %2410 = vmatpush2.bf16.msra.mxu0 %v3582_v14  ;;  %2483 = vmatpush2.bf16.msra.mxu1 %v3585_v15 }
  0xc7   : > { %2411 = vmatprep.subr.bf16.mxu0 %v3590_v17  ;;  %2484 = vmatprep.subr.bf16.mxu1 %v3593_v18  ;;  %v3615_v17 = vld [vmem:[%s5262_s3 + $0x370] ss:$8 sps:$4 sm:$0xff]   ;;  %v3620_v18 = vld [vmem:[%s5262_s3 + $0x264] ss:$8 sps:$4 sm:$0xff]  }
  0xca   : > { %2412 = vmatpush2.bf16.msra.mxu0 %v3588_v19  ;;  %2485 = vmatpush2.bf16.msra.mxu1 %v3591_v21 }
  0xcb   : > { %2413 = vmatprep.subr.bf16.mxu0 %v3596_v22  ;;  %2486 = vmatprep.subr.bf16.mxu1 %v3599_v23  ;;  %v3623_v23 = vld [vmem:[%s5262_s3 + $0x364] ss:$8 sps:$4 sm:$0xff]  }
  0xce   : > { %2414 = vmatpush2.bf16.msra.mxu0 %v3594_v24  ;;  %2487 = vmatpush2.bf16.msra.mxu1 %v3597_v25 }
  0xcf   : > { %2415 = vmatprep.subr.bf16.mxu0 %v3602_v27  ;;  %2488 = vmatprep.subr.bf16.mxu1 %v3605_v28 }
  0xd2   : > { %2416 = vmatpush2.bf16.msra.mxu0 %v3600_v29  ;;  %2489 = vmatpush2.bf16.msra.mxu1 %v3603_v30  ;;  %v3618_v30 = vld [vmem:[%s5262_s3 + $0x260] ss:$8 sps:$4 sm:$0xff]  }
  0xd3   : > { %2417 = vmatprep.subr.bf16.mxu0 %v3608_v31  ;;  %2490 = vmatprep.subr.bf16.mxu1 %v3611_v32 }
  0xd6   : > { %2418 = vmatpush2.bf16.msra.mxu0 %v3606_v33  ;;  %2491 = vmatpush2.bf16.msra.mxu1 %v3609_v34 }
  0xd7   : > { %2533 = vmatprep.subr.bf16.mxu0 %v3614_v35  ;;  %2606 = vmatprep.subr.bf16.mxu1 %v3617_v36  ;;  %v3621_v36 = vld [vmem:[%s5262_s3 + $0x360] ss:$8 sps:$4 sm:$0xff]  }
 0x118   : > { %v1249_v16 = vpop.f32.mrf.mxu0  ;;  %v1322_v58 = vpop.f32.mrf.mxu1 }
 0x119   : > { %v1323_v48 = vadd.f32 %v1322_v58, %v4600_v26  ;;  %v1250_v54 = vadd.f32 %v1249_v16, %v4608_v46 }
 0x11a   : > { %v1251_v47 = vpop.f32.mrf.mxu0  ;;  %v1324_v50 = vpop.f32.mrf.mxu1 }
 0x11b   : > { %v1252_v51 = vadd.f32 %v1251_v47, %v4604_v45  ;;  %v1325_v55 = vadd.f32 %v1324_v50, %v4611_v49  ;;  %v1509_v63 = vmax.f32 %v1323_v48, 0.0  ;;  %v1507_v3 = vmax.f32 %v1250_v54, 0.0  ;;  %v3629_v47 = vld [vmem:[%s5262_s3 + $0x354] ss:$8 sps:$4 sm:$0xff]   ;;  %v3624_v54 = vld [vmem:[%s5262_s3 + $0x250] ss:$8 sps:$4 sm:$0xff]  }
 0x11c   : > { %v1253_v38 = vpop.f32.mrf.mxu0  ;;  %v1326_v53 = vpop.f32.mrf.mxu1 }
 0x11d   : > { %v1254_v52 = vadd.f32 %v1253_v38, %v4608_v46  ;;  %v1327_v56 = vadd.f32 %v1326_v53, %v4600_v26  ;;  %v1508_v0 = vmax.f32 %v1252_v51, 0.0  ;;  %v1510_v4 = vmax.f32 %v1325_v55, 0.0 }
 0x11e   : > { %v1255_v61 = vpop.f32.mrf.mxu0  ;;  %v1328_v57 = vpop.f32.mrf.mxu1 }
 0x11f   : > { %v1256_v8 = vadd.f32 %v1255_v61, %v4604_v45  ;;  %v1515_v59 = vmax.f32 %v1254_v52, 0.0  ;;  %v1329_v60 = vadd.f32 %v1328_v57, %v4611_v49  ;;  %v1517_v20 = vmax.f32 %v1327_v56, 0.0 }
 0x120   : > { %v1259_v62 = vpop.f32.mrf.mxu0  ;;  %v1332_v2 = vpop.f32.mrf.mxu1 }
 0x121   : > { %v1516_v1 = vmax.f32 %v1256_v8, 0.0  ;;  %v1518_v5 = vmax.f32 %v1329_v60, 0.0  ;;  %v1260_v6 = vadd.f32 %v1259_v62, %v4608_v46  ;;  %v1333_v11 = vadd.f32 %v1332_v2, %v4600_v26  ;;  %v3632_v60 = vld [vmem:[%s5262_s3 + $0x244] ss:$8 sps:$4 sm:$0xff]  }
 0x122   : > { %v1261_v7 = vpop.f32.mrf.mxu0  ;;  %v1334_v13 = vpop.f32.mrf.mxu1  ;;  %v1587_v14 = vpack.c.bf16 %v1515_v59, %v1507_v3  ;;  %v1589_v22 = vpack.c.bf16 %v1517_v20, %v1509_v63  ;;  %v3627_v59 = vld [vmem:[%s5262_s3 + $0x350] ss:$8 sps:$4 sm:$0xff]   ;;  %v3635_v20 = vld [vmem:[%s5262_s3 + $0x344] ss:$8 sps:$4 sm:$0xff]  }
 0x123   : > { %v1588_v9 = vpack.c.bf16 %v1516_v1, %v1508_v0  ;;  %v1262_v12 = vadd.f32 %v1261_v7, %v4604_v45  ;;  %v1590_v15 = vpack.c.bf16 %v1518_v5, %v1510_v4  ;;  %v1335_v19 = vadd.f32 %v1334_v13, %v4611_v49  ;;  %v3633_v13 = vld [vmem:[%s5262_s3 + $0x340] ss:$8 sps:$4 sm:$0xff]  }
 0x124   : > { %v1263_v21 = vpop.f32.mrf.mxu0  ;;  %v1336_v25 = vpop.f32.mrf.mxu1  ;;  %v1523_v27 = vmax.f32 %v1260_v6, 0.0  ;;  %v1525_v31 = vmax.f32 %v1333_v11, 0.0  ;;  %v3630_v6 = vld [vmem:[%s5262_s3 + $0x240] ss:$8 sps:$4 sm:$0xff]  }
 0x125   : > { %2419 = vmatprep.mubr.bf16.mxu0 %v1588_v9  ;;  %v1264_v24 = vadd.f32 %v1263_v21, %v4608_v46  ;;  %2492 = vmatprep.mubr.bf16.mxu1 %v1590_v15  ;;  %v1337_v28 = vadd.f32 %v1336_v25, %v4600_v26  ;;  %v1524_v32 = vmax.f32 %v1262_v12, 0.0  ;;  %v1526_v40 = vmax.f32 %v1335_v19, 0.0  ;;  %v3641_v21 = vld [vmem:[%s5262_s3 + $0x334] ss:$8 sps:$4 sm:$0xff]  }
 0x126   : > { %2420 = vmatmul.mubr.bf16.vlgmr.msra.gmra.mxu0 %v1587_v14  ;;  %v1265_v29 = vpop.f32.mrf.mxu0  ;;  %2493 = vmatmul.mubr.bf16.vlgmr.msra.gmra.mxu1 %v1589_v22  ;;  %v1338_v35 = vpop.f32.mrf.mxu1  ;;  %v3638_v14 = vld [vmem:[%s5262_s3 + $0x234] ss:$8 sps:$4 sm:$0xff]  }
 0x127   : > { %2534 = vmatpush1.bf16.msra.mxu0 %v3612_v10  ;;  %v1531_v33 = vmax.f32 %v1264_v24, 0.0  ;;  %v1266_v34 = vadd.f32 %v1265_v29, %v4604_v45  ;;  %2607 = vmatpush1.bf16.msra.mxu1 %v3615_v17  ;;  %v1533_v44 = vmax.f32 %v1337_v28, 0.0  ;;  %v1339_v16 = vadd.f32 %v1338_v35, %v4611_v49  ;;  %v3636_v29 = vld [vmem:[%s5262_s3 + $0x230] ss:$8 sps:$4 sm:$0xff]  }
 0x128   : > { %2535 = vmatprep.subr.bf16.mxu0 %v3620_v18  ;;  %v1269_v58 = vpop.f32.mrf.mxu0  ;;  %2608 = vmatprep.subr.bf16.mxu1 %v3623_v23  ;;  %v1342_v38 = vpop.f32.mrf.mxu1  ;;  %v3639_v35 = vld [vmem:[%s5262_s3 + $0x330] ss:$8 sps:$4 sm:$0xff]  }
 0x129   : > { %v1532_v50 = vmax.f32 %v1266_v34, 0.0  ;;  %v1595_v48 = vpack.c.bf16 %v1531_v33, %v1523_v27  ;;  %v1534_v51 = vmax.f32 %v1339_v16, 0.0  ;;  %v1270_v52 = vadd.f32 %v1269_v58, %v4608_v46  ;;  %v3647_v16 = vld [vmem:[%s5262_s3 + $0x324] ss:$8 sps:$4 sm:$0xff]  }
 0x12a   : > { %v1271_v53 = vpop.f32.mrf.mxu0  ;;  %v1597_v55 = vpack.c.bf16 %v1533_v44, %v1525_v31  ;;  %v1343_v61 = vadd.f32 %v1342_v38, %v4600_v26  ;;  %v1344_v57 = vpop.f32.mrf.mxu1 }
 0x12b   : > { %2536 = vmatpush1.bf16.msra.mxu0 %v3618_v30  ;;  %v1596_v56 = vpack.c.bf16 %v1532_v50, %v1524_v32  ;;  %v1272_v8 = vadd.f32 %v1271_v53, %v4604_v45  ;;  %2609 = vmatpush1.bf16.msra.mxu1 %v3621_v36  ;;  %v1598_v62 = vpack.c.bf16 %v1534_v51, %v1526_v40  ;;  %v1539_v3 = vmax.f32 %v1270_v52, 0.0  ;;  %v3644_v36 = vld [vmem:[%s5262_s3 + $0x224] ss:$8 sps:$4 sm:$0xff]   ;;  %v3642_v51 = vld [vmem:[%s5262_s3 + $0x220] ss:$8 sps:$4 sm:$0xff]  }
 0x12c   : > { %2537 = vmatprep.subr.bf16.mxu0 %v3626_v37  ;;  %v1345_v63 = vadd.f32 %v1344_v57, %v4611_v49  ;;  %v1273_v0 = vpop.f32.mrf.mxu0  ;;  %2610 = vmatprep.subr.bf16.mxu1 %v3629_v47  ;;  %v1346_v2 = vpop.f32.mrf.mxu1  ;;  %v1541_v7 = vmax.f32 %v1343_v61, 0.0 }
 0x12d   : > { %v1274_v1 = vadd.f32 %v1273_v0, %v4608_v46  ;;  %2429 = vmatprep.mubr.bf16.mxu0 %v1596_v56  ;;  %v1347_v4 = vadd.f32 %v1346_v2, %v4600_v26  ;;  %2502 = vmatprep.mubr.bf16.mxu1 %v1598_v62  ;;  %v1540_v9 = vmax.f32 %v1272_v8, 0.0 }
 0x12e   : > { %v1275_v5 = vpop.f32.mrf.mxu0  ;;  %2430 = vmatmul.mubr.bf16.gmra.mxu0 %v1595_v48  ;;  %v1348_v12 = vpop.f32.mrf.mxu1  ;;  %2503 = vmatmul.mubr.bf16.gmra.mxu1 %v1597_v55  ;;  %v1542_v15 = vmax.f32 %v1345_v63, 0.0  ;;  %v3648_v63 = vld [vmem:[%s5262_s3 + $0x210] ss:$8 sps:$4 sm:$0xff]  }
 0x12f   : > { %2538 = vmatpush1.bf16.msra.mxu0 %v3624_v54  ;;  %v1547_v10 = vmax.f32 %v1274_v1, 0.0  ;;  %v1276_v11 = vadd.f32 %v1275_v5, %v4604_v45  ;;  %2611 = vmatpush1.bf16.msra.mxu1 %v3627_v59  ;;  %v1549_v17 = vmax.f32 %v1347_v4, 0.0  ;;  %v1349_v18 = vadd.f32 %v1348_v12, %v4611_v49  ;;  %v3656_v1 = vld [vmem:[%s5262_s3 + $0x204] ss:$8 sps:$4 sm:$0xff]   ;;  %v3654_v4 = vld [vmem:[%s5262_s3 + $0x200] ss:$8 sps:$4 sm:$0xff]  }
 0x130   : > { %2539 = vmatprep.subr.bf16.mxu0 %v3632_v60  ;;  %v1279_v19 = vpop.f32.mrf.mxu0  ;;  %2612 = vmatprep.subr.bf16.mxu1 %v3635_v20  ;;  %v1352_v23 = vpop.f32.mrf.mxu1  ;;  %v3657_v5 = vld [vmem:[%s5262_s3 + $0x300] ss:$8 sps:$4 sm:$0xff]   ;;  %v3671_v12 = vld [vmem:[%s5262_s3 + $0x3e4] ss:$8 sps:$4 sm:$0xff]  }
 0x131   : > { %v1548_v22 = vmax.f32 %v1276_v11, 0.0  ;;  %v1603_v24 = vpack.c.bf16 %v1547_v10, %v1539_v3  ;;  %v1550_v25 = vmax.f32 %v1349_v18, 0.0  ;;  %v1280_v27 = vadd.f32 %v1279_v19, %v4608_v46  ;;  %v3659_v3 = vld [vmem:[%s5262_s3 + $0x304] ss:$8 sps:$4 sm:$0xff]   ;;  %v3663_v10 = vld [vmem:[%s5262_s3 + $0x3f0] ss:$8 sps:$4 sm:$0xff]  }
 0x132   : > { %v1281_v28 = vpop.f32.mrf.mxu0  ;;  %v1605_v30 = vpack.c.bf16 %v1549_v17, %v1541_v7  ;;  %v1353_v32 = vadd.f32 %v1352_v23, %v4600_v26  ;;  %v1354_v34 = vpop.f32.mrf.mxu1  ;;  %v3665_v7 = vld [vmem:[%s5262_s3 + $0x3f4] ss:$8 sps:$4 sm:$0xff]   ;;  %v3668_v11 = vld [vmem:[%s5262_s3 + $0x2e4] ss:$8 sps:$4 sm:$0xff]   ;;  %v3672_v18 = vld [vmem:[%s5262_s3 + $0x2d0] ss:$8 sps:$4 sm:$0xff]  }
 0x133   : > { %2540 = vmatpush1.bf16.msra.mxu0 %v3630_v6  ;;  %v1604_v31 = vpack.c.bf16 %v1548_v22, %v1540_v9  ;;  %v1282_v33 = vadd.f32 %v1281_v28, %v4604_v45  ;;  %2613 = vmatpush1.bf16.msra.mxu1 %v3633_v13  ;;  %v1606_v37 = vpack.c.bf16 %v1550_v25, %v1542_v15  ;;  %v1555_v50 = vmax.f32 %v1280_v27, 0.0  ;;  %v3662_v6 = vld [vmem:[%s5262_s3 + $0x2f4] ss:$8 sps:$4 sm:$0xff]   ;;  %v3660_v9 = vld [vmem:[%s5262_s3 + $0x2f0] ss:$8 sps:$4 sm:$0xff]  }
 0x134   : > { %2541 = vmatprep.subr.bf16.mxu0 %v3638_v14  ;;  %v1355_v40 = vadd.f32 %v1354_v34, %v4611_v49  ;;  %v1283_v44 = vpop.f32.mrf.mxu0  ;;  %2614 = vmatprep.subr.bf16.mxu1 %v3641_v21  ;;  %v1356_v47 = vpop.f32.mrf.mxu1  ;;  %v1557_v52 = vmax.f32 %v1353_v32, 0.0  ;;  %v3666_v13 = vld [vmem:[%s5262_s3 + $0x2e0] ss:$8 sps:$4 sm:$0xff]   ;;  %v3674_v15 = vld [vmem:[%s5262_s3 + $0x2d4] ss:$8 sps:$4 sm:$0xff]   ;;  %v565_v34 = vsub.s32 7, %v4584_v39 }
 0x135   : > { %v1284_v58 = vadd.f32 %v1283_v44, %v4608_v46  ;;  %2439 = vmatprep.mubr.bf16.mxu0 %v1604_v31  ;;  %v1357_v38 = vadd.f32 %v1356_v47, %v4600_v26  ;;  %2512 = vmatprep.mubr.bf16.mxu1 %v1606_v37  ;;  %v1556_v53 = vmax.f32 %v1282_v33, 0.0  ;;  %v3645_v26 = vld [vmem:[%s5262_s3 + $0x320] ss:$8 sps:$4 sm:$0xff]   ;;  %v3650_v46 = vld [vmem:[%s5262_s3 + $0x214] ss:$8 sps:$4 sm:$0xff]   ;;  %v557_v31 = vsub.s32 5, %v4584_v39 }
 0x136   : > { %v1285_v48 = vpop.f32.mrf.mxu0  ;;  %2440 = vmatmul.mubr.bf16.gmra.mxu0 %v1603_v24  ;;  %v1358_v56 = vpop.f32.mrf.mxu1  ;;  %2513 = vmatmul.mubr.bf16.gmra.mxu1 %v1605_v30  ;;  %v1558_v61 = vmax.f32 %v1355_v40, 0.0  ;;  %v3669_v14 = vld [vmem:[%s5262_s3 + $0x3e0] ss:$8 sps:$4 sm:$0xff]   ;;  %v3677_v17 = vld [vmem:[%s5262_s3 + $0x3d4] ss:$8 sps:$4 sm:$0xff]   ;;  %v553_v33 = vsub.s32 4, %v4584_v39 }
 0x137   : > { %2542 = vmatpush1.bf16.msra.mxu0 %v3636_v29  ;;  %v1563_v54 = vmax.f32 %v1284_v58, 0.0  ;;  %v1286_v55 = vadd.f32 %v1285_v48, %v4604_v45  ;;  %2615 = vmatpush1.bf16.msra.mxu1 %v3639_v35  ;;  %v1565_v8 = vmax.f32 %v1357_v38, 0.0  ;;  %v1359_v57 = vadd.f32 %v1358_v56, %v4611_v49  ;;  %v3653_v45 = vld [vmem:[%s5262_s3 + $0x314] ss:$8 sps:$4 sm:$0xff]   ;;  %v3651_v49 = vld [vmem:[%s5262_s3 + $0x310] ss:$8 sps:$4 sm:$0xff]  }
 0x138   : > { %2543 = vmatprep.subr.bf16.mxu0 %v3644_v36  ;;  %2616 = vmatprep.subr.bf16.mxu1 %v3647_v16  ;;  %v3675_v19 = vld [vmem:[%s5262_s3 + $0x3d0] ss:$8 sps:$4 sm:$0xff]   ;;  %v3680_v21 = vld [vmem:[%s5262_s3 + $0x2c4] ss:$8 sps:$4 sm:$0xff]   ;;  %v3678_v23 = vld [vmem:[%s5262_s3 + $0x2c0] ss:$8 sps:$4 sm:$0xff]   ;;  %v4815_v58 = vrot.slane %v4593_v42, %v557_v31  ;;  %v4821_v47 = vrot.slane %v4593_v42, %v553_v33  ;;  %v4824_v38 = vrot.slane %v4593_v42, %v565_v34 }
 0x139   : > { %v1564_v59 = vmax.f32 %v1286_v55, 0.0  ;;  %v1611_v60 = vpack.c.bf16 %v1563_v54, %v1555_v50  ;;  %v1566_v62 = vmax.f32 %v1359_v57, 0.0  ;;  %v1613_v0 = vpack.c.bf16 %v1565_v8, %v1557_v52  ;;  %v3683_v22 = vld [vmem:[%s5262_s3 + $0x3c4] ss:$8 sps:$4 sm:$0xff]   ;;  %v3681_v24 = vld [vmem:[%s5262_s3 + $0x3c0] ss:$8 sps:$4 sm:$0xff]  }
 0x13a   : > { %v3686_v25 = vld [vmem:[%s5262_s3 + $0x2b4] ss:$8 sps:$4 sm:$0xff]   ;;  %v3684_v28 = vld [vmem:[%s5262_s3 + $0x2b0] ss:$8 sps:$4 sm:$0xff]   ;;  %v3692_v30 = vld [vmem:[%s5262_s3 + $0x2a4] ss:$8 sps:$4 sm:$0xff]  }
 0x13b   : > { %2544 = vmatpush1.bf16.msra.mxu0 %v3642_v51  ;;  %v1612_v20 = vpack.c.bf16 %v1564_v59, %v1556_v53  ;;  %2617 = vmatpush1.bf16.msra.mxu1 %v3645_v26  ;;  %v1614_v2 = vpack.c.bf16 %v1566_v62, %v1558_v61  ;;  %v3689_v27 = vld [vmem:[%s5262_s3 + $0x3b4] ss:$8 sps:$4 sm:$0xff]   ;;  %v3687_v29 = vld [vmem:[%s5262_s3 + $0x3b0] ss:$8 sps:$4 sm:$0xff]   ;;  %v3695_v32 = vld [vmem:[%s5262_s3 + $0x3a4] ss:$8 sps:$4 sm:$0xff]  }
 0x13c   : > { %2545 = vmatprep.subr.bf16.mxu0 %v3650_v46  ;;  %2618 = vmatprep.subr.bf16.mxu1 %v3653_v45  ;;  %v561_v35 = vsub.s32 6, %v4584_v39  ;;  %v3690_v36 = vld [vmem:[%s5262_s3 + $0x2a0] ss:$8 sps:$4 sm:$0xff]   ;;  %v3698_v44 = vld [vmem:[%s5262_s3 + $0x294] ss:$8 sps:$4 sm:$0xff]  }
 0x13d   : > { %2449 = vmatprep.mubr.bf16.mxu0 %v1612_v20  ;;  %2522 = vmatprep.mubr.bf16.mxu1 %v1614_v2  ;;  %v3693_v40 = vld [vmem:[%s5262_s3 + $0x3a0] ss:$8 sps:$4 sm:$0xff]   ;;  %v3701_v39 = vld [vmem:[%s5262_s3 + $0x394] ss:$8 sps:$4 sm:$0xff]   ;;  %v3696_v52 = vld [vmem:[%s5262_s3 + $0x290] ss:$8 sps:$4 sm:$0xff]  }
 0x13e   : > { %2450 = vmatmul.mubr.bf16.gmra.mxu0 %v1611_v60  ;;  %2523 = vmatmul.mubr.bf16.gmra.mxu1 %v1613_v0  ;;  %v4827_v48 = vrot.slane %v4593_v42, %v561_v35  ;;  %v3699_v54 = vld [vmem:[%s5262_s3 + $0x390] ss:$8 sps:$4 sm:$0xff]   ;;  %v3704_v55 = vld [vmem:[%s5262_s3 + $0x284] ss:$8 sps:$4 sm:$0xff]  }
 0x13f   : > { %2546 = vmatpush1.bf16.msra.mxu0 %v3648_v63  ;;  %2619 = vmatpush1.bf16.msra.mxu1 %v3651_v49  ;;  %v3707_v46 = vld [vmem:[%s5262_s3 + $0x384] ss:$8 sps:$4 sm:$0xff]   ;;  %v3702_v63 = vld [vmem:[%s5262_s3 + $0x280] ss:$8 sps:$4 sm:$0xff]  }
 0x140   : > { %2547 = vmatprep.subr.bf16.mxu0 %v3656_v1  ;;  %2620 = vmatprep.subr.bf16.mxu1 %v3659_v3  ;;  %v3705_v1 = vld [vmem:[%s5262_s3 + $0x380] ss:$8 sps:$4 sm:$0xff]  }
 0x143   : > { %2548 = vmatpush1.bf16.msra.mxu0 %v3654_v4  ;;  %2621 = vmatpush1.bf16.msra.mxu1 %v3657_v5 }
 0x144   : > { %2549 = vmatprep.subr.bf16.mxu0 %v3662_v6  ;;  %2622 = vmatprep.subr.bf16.mxu1 %v3665_v7 }
 0x147   : > { %2550 = vmatpush2.bf16.msra.mxu0 %v3660_v9  ;;  %2623 = vmatpush2.bf16.msra.mxu1 %v3663_v10 }
 0x148   : > { %2551 = vmatprep.subr.bf16.mxu0 %v3668_v11  ;;  %2624 = vmatprep.subr.bf16.mxu1 %v3671_v12 }
 0x14b   : > { %2552 = vmatpush2.bf16.msra.mxu0 %v3666_v13  ;;  %2625 = vmatpush2.bf16.msra.mxu1 %v3669_v14 }
 0x14c   : > { %2553 = vmatprep.subr.bf16.mxu0 %v3674_v15  ;;  %2626 = vmatprep.subr.bf16.mxu1 %v3677_v17 }
 0x14f   : > { %2554 = vmatpush2.bf16.msra.mxu0 %v3672_v18  ;;  %2627 = vmatpush2.bf16.msra.mxu1 %v3675_v19 }
 0x150   : > { %2555 = vmatprep.subr.bf16.mxu0 %v3680_v21  ;;  %2628 = vmatprep.subr.bf16.mxu1 %v3683_v22 }
 0x153   : > { %2556 = vmatpush2.bf16.msra.mxu0 %v3678_v23  ;;  %2629 = vmatpush2.bf16.msra.mxu1 %v3681_v24 }
 0x154   : > { %2557 = vmatprep.subr.bf16.mxu0 %v3686_v25  ;;  %2630 = vmatprep.subr.bf16.mxu1 %v3689_v27 }
 0x157   : > { %2558 = vmatpush2.bf16.msra.mxu0 %v3684_v28  ;;  %2631 = vmatpush2.bf16.msra.mxu1 %v3687_v29 }
 0x158   : > { %v1395_v37 = vpop.f32.mrf.mxu0  ;;  %2559 = vmatprep.subr.bf16.mxu0 %v3692_v30  ;;  %v1468_v16 = vpop.f32.mrf.mxu1  ;;  %2632 = vmatprep.subr.bf16.mxu1 %v3695_v32 }
 0x159   : > { %v1396_v61 = vadd.f32 %v1395_v37, %v4821_v47  ;;  %v1469_v59 = vadd.f32 %v1468_v16, %v4827_v48 }
 0x15a   : > { %v1397_v50 = vpop.f32.mrf.mxu0  ;;  %v1470_v51 = vpop.f32.mrf.mxu1 }
 0x15b   : > { %2560 = vmatpush2.bf16.msra.mxu0 %v3690_v36  ;;  %2633 = vmatpush2.bf16.msra.mxu1 %v3693_v40  ;;  %v1398_v42 = vadd.f32 %v1397_v50, %v4815_v58  ;;  %v1471_v8 = vadd.f32 %v1470_v51, %v4824_v38  ;;  %v1511_v6 = vmax.f32 %v1396_v61, 0.0  ;;  %v1513_v11 = vmax.f32 %v1469_v59, 0.0 }
 0x15c   : > { %v1399_v53 = vpop.f32.mrf.mxu0  ;;  %2561 = vmatprep.subr.bf16.mxu0 %v3698_v44  ;;  %v1472_v26 = vpop.f32.mrf.mxu1  ;;  %2634 = vmatprep.subr.bf16.mxu1 %v3701_v39 }
 0x15d   : > { %v1400_v56 = vadd.f32 %v1399_v53, %v4821_v47  ;;  %v1473_v57 = vadd.f32 %v1472_v26, %v4827_v48  ;;  %v1512_v2 = vmax.f32 %v1398_v42, 0.0  ;;  %v1514_v7 = vmax.f32 %v1471_v8, 0.0 }
 0x15e   : > { %v1401_v45 = vpop.f32.mrf.mxu0  ;;  %v1474_v62 = vpop.f32.mrf.mxu1 }
 0x15f   : > { %v1402_v60 = vadd.f32 %v1401_v45, %v4815_v58  ;;  %2562 = vmatpush2.bf16.msra.mxu0 %v3696_v52  ;;  %v1519_v0 = vmax.f32 %v1400_v56, 0.0  ;;  %v1475_v20 = vadd.f32 %v1474_v62, %v4824_v38  ;;  %2635 = vmatpush2.bf16.msra.mxu1 %v3699_v54  ;;  %v1521_v3 = vmax.f32 %v1473_v57, 0.0 }
 0x160   : > { %v1405_v49 = vpop.f32.mrf.mxu0  ;;  %2563 = vmatprep.subr.bf16.mxu0 %v3704_v55  ;;  %v1478_v5 = vpop.f32.mrf.mxu1  ;;  %2636 = vmatprep.subr.bf16.mxu1 %v3707_v46 }
 0x161   : > { %v1520_v4 = vmax.f32 %v1402_v60, 0.0  ;;  %v1522_v9 = vmax.f32 %v1475_v20, 0.0  ;;  %v1591_v14 = vpack.c.bf16 %v1519_v0, %v1511_v6  ;;  %v1593_v18 = vpack.c.bf16 %v1521_v3, %v1513_v11 }
 0x162   : > { %v1407_v10 = vpop.f32.mrf.mxu0  ;;  %v1480_v13 = vpop.f32.mrf.mxu1  ;;  %v1406_v23 = vadd.f32 %v1405_v49, %v4821_v47  ;;  %v1479_v28 = vadd.f32 %v1478_v5, %v4827_v48 }
 0x163   : > { %v1592_v12 = vpack.c.bf16 %v1520_v4, %v1512_v2  ;;  %2564 = vmatpush2.bf16.msra.mxu0 %v3702_v63  ;;  %v1594_v15 = vpack.c.bf16 %v1522_v9, %v1514_v7  ;;  %2637 = vmatpush2.bf16.msra.mxu1 %v3705_v1  ;;  %v1408_v19 = vadd.f32 %v1407_v10, %v4815_v58 }
 0x164   : > { %v1409_v17 = vpop.f32.mrf.mxu0  ;;  %v1482_v22 = vpop.f32.mrf.mxu1  ;;  %v1481_v24 = vadd.f32 %v1480_v13, %v4824_v38  ;;  %v1527_v40 = vmax.f32 %v1406_v23, 0.0  ;;  %v1529_v50 = vmax.f32 %v1479_v28, 0.0 }
 0x165   : > { %v1410_v21 = vadd.f32 %v1409_v17, %v4821_v47  ;;  %2565 = vmatprep.mubr.bf16.mxu0 %v1592_v12  ;;  %v1483_v25 = vadd.f32 %v1482_v22, %v4827_v48  ;;  %2638 = vmatprep.mubr.bf16.mxu1 %v1594_v15  ;;  %v1528_v34 = vmax.f32 %v1408_v19, 0.0 }
 0x166   : > { %v1411_v27 = vpop.f32.mrf.mxu0  ;;  %2566 = vmatmul.mubr.bf16.vlgmr.msra.gmra.mxu0 %v1591_v14  ;;  %v1484_v30 = vpop.f32.mrf.mxu1  ;;  %2639 = vmatmul.mubr.bf16.vlgmr.msra.gmra.mxu1 %v1593_v18  ;;  %v1530_v44 = vmax.f32 %v1481_v24, 0.0 }
 0x167   : > { %v1412_v29 = vadd.f32 %v1411_v27, %v4815_v58  ;;  %v1535_v31 = vmax.f32 %v1410_v21, 0.0  ;;  %v1485_v32 = vadd.f32 %v1484_v30, %v4824_v38  ;;  %v1537_v35 = vmax.f32 %v1483_v25, 0.0 }
 0x168   : > { %v1415_v33 = vpop.f32.mrf.mxu0  ;;  %v1488_v37 = vpop.f32.mrf.mxu1 }
 0x169   : > { %v1536_v36 = vmax.f32 %v1412_v29, 0.0  ;;  %v1538_v16 = vmax.f32 %v1485_v32, 0.0  ;;  %v1599_v53 = vpack.c.bf16 %v1535_v31, %v1527_v40  ;;  %v1601_v42 = vpack.c.bf16 %v1537_v35, %v1529_v50 }
 0x16a   : > { %v1417_v39 = vpop.f32.mrf.mxu0  ;;  %v1490_v52 = vpop.f32.mrf.mxu1  ;;  %v1416_v61 = vadd.f32 %v1415_v33, %v4821_v47  ;;  %v1489_v59 = vadd.f32 %v1488_v37, %v4827_v48 }
 0x16b   : > { %v1600_v51 = vpack.c.bf16 %v1536_v36, %v1528_v34  ;;  %v1602_v54 = vpack.c.bf16 %v1538_v16, %v1530_v44  ;;  %v1418_v56 = vadd.f32 %v1417_v39, %v4815_v58  ;;  %v1491_v8 = vadd.f32 %v1490_v52, %v4824_v38 }
 0x16c   : > { %v1419_v55 = vpop.f32.mrf.mxu0  ;;  %v1492_v46 = vpop.f32.mrf.mxu1  ;;  %v1543_v4 = vmax.f32 %v1416_v61, 0.0  ;;  %v1545_v9 = vmax.f32 %v1489_v59, 0.0 }
 0x16d   : > { %v1420_v26 = vadd.f32 %v1419_v55, %v4821_v47  ;;  %2575 = vmatprep.mubr.bf16.mxu0 %v1600_v51  ;;  %v1493_v57 = vadd.f32 %v1492_v46, %v4827_v48  ;;  %2648 = vmatprep.mubr.bf16.mxu1 %v1602_v54  ;;  %v1544_v49 = vmax.f32 %v1418_v56, 0.0  ;;  %v1546_v5 = vmax.f32 %v1491_v8, 0.0 }
 0x16e   : > { %v1421_v45 = vpop.f32.mrf.mxu0  ;;  %2576 = vmatmul.mubr.bf16.gmra.mxu0 %v1599_v53  ;;  %v1494_v62 = vpop.f32.mrf.mxu1  ;;  %2649 = vmatmul.mubr.bf16.gmra.mxu1 %v1601_v42 }
 0x16f   : > { %v1422_v60 = vadd.f32 %v1421_v45, %v4815_v58  ;;  %v1551_v63 = vmax.f32 %v1420_v26, 0.0  ;;  %v1495_v0 = vadd.f32 %v1494_v62, %v4824_v38  ;;  %v1553_v1 = vmax.f32 %v1493_v57, 0.0 }
 0x170   : > { %v1425_v20 = vpop.f32.mrf.mxu0  ;;  %v1498_v3 = vpop.f32.mrf.mxu1 }
 0x171   : > { %v1552_v2 = vmax.f32 %v1422_v60, 0.0  ;;  %v1554_v6 = vmax.f32 %v1495_v0, 0.0  ;;  %v1607_v12 = vpack.c.bf16 %v1551_v63, %v1543_v4  ;;  %v1609_v15 = vpack.c.bf16 %v1553_v1, %v1545_v9 }
 0x172   : > { %v1427_v7 = vpop.f32.mrf.mxu0  ;;  %v1500_v11 = vpop.f32.mrf.mxu1  ;;  %v1426_v21 = vadd.f32 %v1425_v20, %v4821_v47  ;;  %v1499_v25 = vadd.f32 %v1498_v3, %v4827_v48 }
 0x173   : > { %v1608_v10 = vpack.c.bf16 %v1552_v2, %v1544_v49  ;;  %v1610_v13 = vpack.c.bf16 %v1554_v6, %v1546_v5  ;;  %v1428_v17 = vadd.f32 %v1427_v7, %v4815_v58  ;;  %v1501_v22 = vadd.f32 %v1500_v11, %v4824_v38 }
 0x174   : > { %v1429_v14 = vpop.f32.mrf.mxu0  ;;  %v1502_v19 = vpop.f32.mrf.mxu1  ;;  %v1561_v36 = vmax.f32 %v1499_v25, 0.0 }
 0x175   : > { %v1430_v18 = vadd.f32 %v1429_v14, %v4821_v47  ;;  %2585 = vmatprep.mubr.bf16.mxu0 %v1608_v10  ;;  %v1503_v23 = vadd.f32 %v1502_v19, %v4827_v48  ;;  %2658 = vmatprep.mubr.bf16.mxu1 %v1610_v13  ;;  %v1560_v31 = vmax.f32 %v1428_v17, 0.0  ;;  %v1559_v47 = vmax.f32 %v1426_v21, 0.0  ;;  %v2746_v14 = vld [vmem:[%s5263_s4] sm:$0x3] }
 0x176   : > { %v1431_v24 = vpop.f32.mrf.mxu0  ;;  %2586 = vmatmul.mubr.bf16.gmra.mxu0 %v1607_v12  ;;  %v1504_v28 = vpop.f32.mrf.mxu1  ;;  %2659 = vmatmul.mubr.bf16.gmra.mxu1 %v1609_v15  ;;  %v1562_v34 = vmax.f32 %v1501_v22, 0.0 }
 0x177   : > { %v1432_v27 = vadd.f32 %v1431_v24, %v4815_v58  ;;  %v1567_v29 = vmax.f32 %v1430_v18, 0.0  ;;  %v1505_v30 = vadd.f32 %v1504_v28, %v4824_v38  ;;  %v1569_v32 = vmax.f32 %v1503_v23, 0.0 }
 0x178   : > { %v4915_v23 = vrot.slane %v2746_v14, %v4596_v43  ;;  %v4918_v24 = vrot.slane %v2746_v14, %v4588_v41  ;;  %v3744_v14 = vld [vmem:[%s4014_s10 + $0x20] sm:$0xff] }
 0x179   : > { %v1568_v33 = vmax.f32 %v1432_v27, 0.0  ;;  %v1570_v35 = vmax.f32 %v1505_v30, 0.0  ;;  %v1615_v40 = vpack.c.bf16 %v1567_v29, %v1559_v47  ;;  %v1617_v16 = vpack.c.bf16 %v1569_v32, %v1561_v36  ;;  %v3740_v27 = vld [vmem:[%s4014_s10] sm:$0xff]  ;;  %v3741_v47 = vld [vmem:[%s4014_s10 + $0x8] sm:$0xff] }
 0x17b   : > { %v1616_v37 = vpack.c.bf16 %v1568_v33, %v1560_v31  ;;  %v1618_v44 = vpack.c.bf16 %v1570_v35, %v1562_v34 }
 0x17d   : > { %2595 = vmatprep.mubr.bf16.mxu0 %v1616_v37  ;;  %2668 = vmatprep.mubr.bf16.mxu1 %v1618_v44 }
 0x17e   : > { %2596 = vmatmul.mubr.bf16.gmra.mxu0 %v1615_v40  ;;  %2669 = vmatmul.mubr.bf16.gmra.mxu1 %v1617_v16 }
 0x1e6   : > { %v2421_v58 = vpop.f32.mrf.mxu0  ;;  %v2494_v48 = vpop.f32.mrf.mxu1 }
 0x1e7   : > { %v2495_v7 = vadd.f32 %v2494_v48, %v2421_v58  ;;  %v3742_v58 = vld [vmem:[%s4014_s10 + $0x10] sm:$0xff] }
 0x1e8   : > { %v2423_v39 = vpop.f32.mrf.mxu0  ;;  %v2496_v50 = vpop.f32.mrf.mxu1 }
 0x1e9   : > { %v2497_v11 = vadd.f32 %v2496_v50, %v2423_v39 }
 0x1ea   : > { %v2425_v38 = vpop.f32.mrf.mxu0  ;;  %v2498_v51 = vpop.f32.mrf.mxu1 }
 0x1eb   : > { %v2499_v17 = vadd.f32 %v2498_v51, %v2425_v38 }
 0x1ec   : > { %v2427_v52 = vpop.f32.mrf.mxu0  ;;  %v2500_v53 = vpop.f32.mrf.mxu1 }
 0x1ed   : > { %v2501_v25 = vadd.f32 %v2500_v53, %v2427_v52 }
 0x1ee   : > { %v2431_v54 = vpop.f32.mrf.mxu0  ;;  %v2504_v55 = vpop.f32.mrf.mxu1 }
 0x1ef   : > { %v2505_v33 = vadd.f32 %v2504_v55, %v2431_v54  ;;  %v3743_v54 = vld [vmem:[%s4014_s10 + $0x18] sm:$0xff] }
 0x1f0   : > { %v2433_v42 = vpop.f32.mrf.mxu0  ;;  %v2506_v56 = vpop.f32.mrf.mxu1 }
 0x1f1   : > { %v2507_v40 = vadd.f32 %v2506_v56, %v2433_v42 }
 0x1f2   : > { %v2435_v26 = vpop.f32.mrf.mxu0  ;;  %v2508_v46 = vpop.f32.mrf.mxu1 }
 0x1f3   : > { %v2509_v52 = vadd.f32 %v2508_v46, %v2435_v26 }
 0x1f4   : > { %v2437_v61 = vpop.f32.mrf.mxu0  ;;  %v2510_v8 = vpop.f32.mrf.mxu1 }
 0x1f6   : > { %v4879_v57 = vpop.f32.mrf.mxu0  ;;  %v4881_v45 = vpop.f32.mrf.mxu1 }
 0x1f8   : > { %v4883_v59 = vpop.f32.mrf.mxu0  ;;  %v4885_v60 = vpop.f32.mrf.mxu1 }
 0x1fa   : > { %v4887_v62 = vpop.f32.mrf.mxu0  ;;  %v4889_v63 = vpop.f32.mrf.mxu1 }
 0x1fc   : > { %v4891_v0 = vpop.f32.mrf.mxu0  ;;  %v4893_v20 = vpop.f32.mrf.mxu1 }
 0x1fe   : > { %v4895_v49 = vpop.f32.mrf.mxu0  ;;  %v4897_v1 = vpop.f32.mrf.mxu1 }
 0x200   : > { %v4899_v2 = vpop.f32.mrf.mxu0  ;;  %v4901_v3 = vpop.f32.mrf.mxu1 }
 0x202   : > { %v4903_v4 = vpop.f32.mrf.mxu0  ;;  %v4905_v5 = vpop.f32.mrf.mxu1 }
 0x204   : > { %v4907_v6 = vpop.f32.mrf.mxu0  ;;  %v4909_v9 = vpop.f32.mrf.mxu1 }
 0x226   : > { %v2567_v10 = vpop.f32.mrf.mxu0  ;;  %v2640_v13 = vpop.f32.mrf.mxu1 }
 0x227   : > { %v2568_v12 = vadd.f32 %v2567_v10, %v2495_v7 }
 0x228   : > { %v2569_v15 = vpop.f32.mrf.mxu0  ;;  %v2642_v21 = vpop.f32.mrf.mxu1 }
 0x229   : > { %v2641_v18 = vadd.f32 %v2640_v13, %v2568_v12  ;;  %v2570_v19 = vadd.f32 %v2569_v15, %v2497_v11  ;;  %v2511_v11 = vadd.f32 %v2510_v8, %v2437_v61 }
 0x22a   : > { %v2571_v22 = vpop.f32.mrf.mxu0  ;;  %v2644_v31 = vpop.f32.mrf.mxu1 }
 0x22b   : > { %v2730_v28 = vadd.f32 %v3740_v27, %v2641_v18  ;;  %v2643_v29 = vadd.f32 %v2642_v21, %v2570_v19  ;;  %v2572_v30 = vadd.f32 %v2571_v22, %v2499_v17  ;;  %v2515_v19 = vadd.f32 %v4881_v45, %v4879_v57  ;;  %v3745_v22 = vld [vmem:[%s4014_s10 + $0x28] sm:$0xff] }
 0x22c   : > { %v2573_v32 = vpop.f32.mrf.mxu0  ;;  %v2646_v37 = vpop.f32.mrf.mxu1 }
 0x22d   : > { %v2731_v34 = vadd.f32 %v3741_v47, %v2643_v29  ;;  %v2645_v35 = vadd.f32 %v2644_v31, %v2572_v30  ;;  %v2574_v36 = vadd.f32 %v2573_v32, %v2501_v25  ;;  %v4923_v16 = vadd.f32 %v4915_v23, %v2730_v28  ;;  %v3746_v32 = vld [vmem:[%s4014_s10 + $0x30] sm:$0xff] }
 0x22e   : > { %v2577_v44 = vpop.f32.mrf.mxu0  ;;  %v2650_v38 = vpop.f32.mrf.mxu1  ;;  %v2517_v29 = vadd.f32 %v4885_v60, %v4883_v59 }
 0x22f   : > { %v2732_v48 = vadd.f32 %v3742_v58, %v2645_v35  ;;  %v2647_v39 = vadd.f32 %v2646_v37, %v2574_v36  ;;  %v2578_v50 = vadd.f32 %v2577_v44, %v2505_v33  ;;  %v4927_v51 = vadd.f32 %v4918_v24, %v2731_v34  ;;  %v3747_v37 = vld [vmem:[%s4014_s10 + $0x38] sm:$0xff] }
 0x230   : > { %v2579_v53 = vpop.f32.mrf.mxu0  ;;  %v2652_v56 = vpop.f32.mrf.mxu1  ;;  %v2519_v35 = vadd.f32 %v4889_v63, %v4887_v62 }
 0x231   : > { %v2733_v55 = vadd.f32 %v3743_v54, %v2647_v39  ;;  %v2651_v7 = vadd.f32 %v2650_v38, %v2578_v50  ;;  %v2580_v42 = vadd.f32 %v2579_v53, %v2507_v40  ;;  %v2774_v10 = vadd.f32 %v4927_v51, %v4923_v16  ;;  %v3748_v38 = vld [vmem:[%s4014_s10 + $0x40] sm:$0xff] }
 0x232   : > { %v2581_v12 = vpop.f32.mrf.mxu0  ;;  %v4933_v13 = vadd.f32 %v4915_v23, %v2732_v48  ;;  %v2654_v46 = vpop.f32.mrf.mxu1  ;;  %v2521_v48 = vadd.f32 %v4893_v20, %v4891_v0 }
 0x233   : > { %v2734_v15 = vadd.f32 %v3744_v14, %v2651_v7  ;;  %v2653_v17 = vadd.f32 %v2652_v56, %v2580_v42  ;;  %v2582_v26 = vadd.f32 %v2581_v12, %v2509_v52  ;;  %2775 = vadd.xlane.f32.xlu0 %v2774_v10  ;;  %v4937_v18 = vadd.f32 %v4918_v24, %v2733_v55  ;;  %v3749_v42 = vld [vmem:[%s4014_s10 + $0x48] sm:$0xff] }
 0x234   : > { %v2583_v21 = vpop.f32.mrf.mxu0  ;;  %v2656_v27 = vpop.f32.mrf.mxu1  ;;  %v2525_v55 = vadd.f32 %v4897_v1, %v4895_v49  ;;  %v2527_v12 = vadd.f32 %v4901_v3, %v4899_v2 }
 0x235   : > { %v2735_v61 = vadd.f32 %v3745_v22, %v2653_v17  ;;  %v2655_v8 = vadd.f32 %v2654_v46, %v2582_v26  ;;  %v2584_v25 = vadd.f32 %v2583_v21, %v2511_v11  ;;  %v2777_v28 = vadd.f32 %v4937_v18, %v4933_v13  ;;  %v3750_v17 = vld [vmem:[%s4014_s10 + $0x50] sm:$0xff] }
 0x236   : > { %v2587_v30 = vpop.f32.mrf.mxu0  ;;  %v4947_v31 = vadd.f32 %v4915_v23, %v2734_v15  ;;  %v2660_v47 = vpop.f32.mrf.mxu1  ;;  %v2529_v21 = vadd.f32 %v4905_v5, %v4903_v4 }
 0x237   : > { %v2736_v33 = vadd.f32 %v3746_v32, %v2655_v8  ;;  %v2657_v57 = vadd.f32 %v2656_v27, %v2584_v25  ;;  %v2588_v45 = vadd.f32 %v2587_v30, %v2515_v19  ;;  %2778 = vadd.xlane.f32.xlu0 %v2777_v28  ;;  %v4951_v34 = vadd.f32 %v4918_v24, %v2735_v61  ;;  %v3751_v61 = vld [vmem:[%s4014_s10 + $0x58] sm:$0xff]  ;;  %v3752_v32 = vld [vmem:[%s4014_s10 + $0x60] sm:$0xff] }
 0x238   : > { %v2589_v36 = vpop.f32.mrf.mxu0  ;;  %v2662_v44 = vpop.f32.mrf.mxu1  ;;  %v2531_v28 = vadd.f32 %v4909_v9, %v4907_v6 }
 0x239   : > { %v2737_v59 = vadd.f32 %v3747_v37, %v2657_v57  ;;  %v2661_v60 = vadd.f32 %v2660_v47, %v2588_v45  ;;  %v2590_v40 = vadd.f32 %v2589_v36, %v2517_v29  ;;  %v2780_v58 = vadd.f32 %v4951_v34, %v4947_v31 }
 0x23a   : > { %v2591_v39 = vpop.f32.mrf.mxu0  ;;  %v4961_v50 = vadd.f32 %v4915_v23, %v2736_v33  ;;  %v2664_v53 = vpop.f32.mrf.mxu1 }
 0x23b   : > { %v2738_v52 = vadd.f32 %v3748_v38, %v2661_v60  ;;  %v2663_v62 = vadd.f32 %v2662_v44, %v2590_v40  ;;  %v2592_v63 = vadd.f32 %v2591_v39, %v2519_v35  ;;  %2781 = vadd.xlane.f32.xlu1 %v2780_v58  ;;  %v4965_v54 = vadd.f32 %v4918_v24, %v2737_v59  ;;  %v3753_v35 = vld [vmem:[%s4014_s10 + $0x68] sm:$0xff]  ;;  %v3754_v60 = vld [vmem:[%s4014_s10 + $0x70] sm:$0xff]  ;;  %v3755_v39 = vld [vmem:[%s4014_s10 + $0x78] sm:$0xff]  ;;  %s3834_s10 = smov [#allocation3]  }
 0x23c   : > { %v2593_v7 = vpop.f32.mrf.mxu0  ;;  %v2666_v10 = vpop.f32.mrf.mxu1  ;;  %s3760_s17 = sshll.u32 %s3834_s10, 4  ;;  %s3761_s17 = int_to_ptr.vmem [resolvable:$false] %s3760_s17 }
 0x23d   : > { %v2739_v0 = vadd.f32 %v3749_v42, %v2663_v62  ;;  %v2665_v20 = vadd.f32 %v2664_v53, %v2592_v63  ;;  %v2594_v56 = vadd.f32 %v2593_v7, %v2521_v48  ;;  %v2783_v11 = vadd.f32 %v4965_v54, %v4961_v50  ;;  %s3762_s18 = scalar_lea.vmem %s3761_s17, 4096  ;;  %p3763_p1 = scmp.lt.s32.totalorder %s5204_s30, %s3761_s17 }
 0x23e   : > { %v2597_v14 = vpop.f32.mrf.mxu0  ;;  %v4975_v15 = vadd.f32 %v4915_v23, %v2738_v52  ;;  %v2670_v46 = vpop.f32.mrf.mxu1  ;;  %p3764_p2 = scmp.lt.s32.totalorder %s3762_s18, %s3756_s16 }
 0x23f   : > { %v2740_v26 = vadd.f32 %v3750_v17, %v2665_v20  ;;  %v2667_v49 = vadd.f32 %v2666_v10, %v2594_v56  ;;  %v2598_v1 = vadd.f32 %v2597_v14, %v2525_v55  ;;  %2784 = vadd.xlane.f32.xlu1 %v2783_v11  ;;  %v4979_v19 = vadd.f32 %v4918_v24, %v2739_v0 }
 0x240   : > { %v2599_v22 = vpop.f32.mrf.mxu0  ;;  %v2672_v25 = vpop.f32.mrf.mxu1  ;;  %p3765_p3 = por %p3764_p2, %p3763_p1 }
 0x241   : > { %v2741_v2 = vadd.f32 %v3751_v61, %v2667_v49  ;;  %v2671_v3 = vadd.f32 %v2670_v46, %v2598_v1  ;;  %v2600_v8 = vadd.f32 %v2599_v22, %v2527_v12  ;;  %v2786_v27 = vadd.f32 %v4979_v19, %v4975_v15 }
 0x242   : > { %v2601_v29 = vpop.f32.mrf.mxu0  ;;  %v4989_v30 = vadd.f32 %v4915_v23, %v2740_v26  ;;  %v2674_v57 = vpop.f32.mrf.mxu1  ;;  %p3766_p5 = pnand %p3765_p3, %p3759_p0 }
 0x243   : > { %v2742_v4 = vadd.f32 %v3752_v32, %v2671_v3  ;;  %v2673_v5 = vadd.f32 %v2672_v25, %v2600_v8  ;;  %v2602_v33 = vadd.f32 %v2601_v29, %v2529_v21  ;;  %2787 = vadd.xlane.f32.xlu0 %v2786_v27  ;;  %v4993_v45 = vadd.f32 %v4918_v24, %v2741_v2 }
 0x244   : > { %v2603_v47 = vpop.f32.mrf.mxu0  ;;  %v2676_v59 = vpop.f32.mrf.mxu1 }
 0x245   : > { %v2743_v36 = vadd.f32 %v3753_v35, %v2673_v5  ;;  %v2675_v37 = vadd.f32 %v2674_v57, %v2602_v33  ;;  %v2604_v6 = vadd.f32 %v2603_v47, %v2531_v28  ;;  %v2789_v9 = vadd.f32 %v4993_v45, %v4989_v30 }
 0x246   : > { %v2770_v58 = vadd.f32 %v4915_v23, %v2742_v4 }
 0x247   : > { %v2744_v40 = vadd.f32 %v3754_v60, %v2675_v37  ;;  %v2677_v44 = vadd.f32 %v2676_v59, %v2604_v6  ;;  %2790 = vadd.xlane.f32.xlu1 %v2789_v9  ;;  %v2771_v48 = vadd.f32 %v4918_v24, %v2743_v36 }
 0x249   : > { %v2745_v38 = vadd.f32 %v3755_v39, %v2677_v44  ;;  %v2792_v52 = vadd.f32 %v2771_v48, %v2770_v58  ;;  %v2772_v62 = vadd.f32 %v4915_v23, %v2744_v40 }
 0x24b   : > { %2793 = vadd.xlane.f32.xlu0 %v2792_v52  ;;  %v2773_v63 = vadd.f32 %v4918_v24, %v2745_v38 }
 0x24d   : > { %v2795_v53 = vadd.f32 %v2773_v63, %v2772_v62 }
 0x24f   : > { %2796 = vadd.xlane.f32.xlu1 %v2795_v53 }
 0x2bc   : > { %v2776_v55 = vpop.xlane.xlu0 %2775 }
 0x2bd   : > { %v2799_v7 = vmul.f32 0.00390625, %v2776_v55 }
 0x2bf   : > { %v5005_v42 = vsub.f32 %v4923_v16, %v2799_v7  ;;  %v5008_v0 = vsub.f32 %v4927_v51, %v2799_v7 }
 0x2c0   : > { %v2779_v20 = vpop.xlane.xlu0 %2778 }
 0x2c1   : > { %v2800_v56 = vmul.f32 0.00390625, %v2779_v20  ;;  %v2823_v10 = vmul.f32 %v5005_v42, %v5005_v42  ;;  %v2824_v23 = vmul.f32 %v5008_v0, %v5008_v0 }
 0x2c3   : > { %v5015_v24 = vsub.f32 %v4933_v13, %v2800_v56  ;;  %v5018_v11 = vsub.f32 %v4937_v18, %v2800_v56  ;;  %v2839_v12 = vadd.f32 %v2824_v23, %v2823_v10 }
 0x2c4   : > { %v2782_v16 = vpop.xlane.xlu1 %2781 }
 0x2c5   : > { %v2801_v14 = vmul.f32 0.00390625, %v2782_v16  ;;  %2840 = vadd.xlane.f32.xlu0 %v2839_v12  ;;  %v2825_v51 = vmul.f32 %v5015_v24, %v5015_v24  ;;  %v2826_v17 = vmul.f32 %v5018_v11, %v5018_v11 }
 0x2c7   : > { %v5025_v26 = vsub.f32 %v4947_v31, %v2801_v14  ;;  %v5028_v49 = vsub.f32 %v4951_v34, %v2801_v14  ;;  %v2842_v13 = vadd.f32 %v2826_v17, %v2825_v51 }
 0x2c8   : > { %v2785_v1 = vpop.xlane.xlu1 %2784 }
 0x2c9   : > { %v2802_v18 = vmul.f32 0.00390625, %v2785_v1  ;;  %2843 = vadd.xlane.f32.xlu1 %v2842_v13  ;;  %v2827_v46 = vmul.f32 %v5025_v26, %v5025_v26  ;;  %v2828_v21 = vmul.f32 %v5028_v49, %v5028_v49 }
 0x2cb   : > { %v5035_v22 = vsub.f32 %v4961_v50, %v2802_v18  ;;  %v5038_v61 = vsub.f32 %v4965_v54, %v2802_v18  ;;  %v2845_v31 = vadd.f32 %v2828_v21, %v2827_v46 }
 0x2cc   : > { %v2788_v2 = vpop.xlane.xlu0 %2787 }
 0x2cd   : > { %v2803_v34 = vmul.f32 0.00390625, %v2788_v2  ;;  %2846 = vadd.xlane.f32.xlu0 %v2845_v31  ;;  %v2829_v3 = vmul.f32 %v5035_v22, %v5035_v22  ;;  %v2830_v8 = vmul.f32 %v5038_v61, %v5038_v61 }
 0x2cf   : > { %v5045_v25 = vsub.f32 %v4975_v15, %v2803_v34  ;;  %v5048_v27 = vsub.f32 %v4979_v19, %v2803_v34  ;;  %v2848_v50 = vadd.f32 %v2830_v8, %v2829_v3 }
 0x2d0   : > { %v2791_v28 = vpop.xlane.xlu1 %2790 }
 0x2d1   : > { %v2804_v54 = vmul.f32 0.00390625, %v2791_v28  ;;  %2849 = vadd.xlane.f32.xlu1 %v2848_v50  ;;  %v2831_v29 = vmul.f32 %v5045_v25, %v5045_v25  ;;  %v2832_v32 = vmul.f32 %v5048_v27, %v5048_v27 }
 0x2d3   : > { %v5055_v4 = vsub.f32 %v4989_v30, %v2804_v54  ;;  %v5058_v5 = vsub.f32 %v4993_v45, %v2804_v54  ;;  %v2851_v15 = vadd.f32 %v2832_v32, %v2831_v29 }
 0x2d4   : > { %v2794_v33 = vpop.xlane.xlu0 %2793 }
 0x2d5   : > { %v2805_v19 = vmul.f32 0.00390625, %v2794_v33  ;;  %2852 = vadd.xlane.f32.xlu0 %v2851_v15  ;;  %v2833_v57 = vmul.f32 %v5055_v4, %v5055_v4  ;;  %v2834_v47 = vmul.f32 %v5058_v5, %v5058_v5 }
 0x2d7   : > { %v5064_v35 = vsub.f32 %v2770_v58, %v2805_v19  ;;  %v5066_v36 = vsub.f32 %v2771_v48, %v2805_v19  ;;  %v2854_v37 = vadd.f32 %v2834_v47, %v2833_v57 }
 0x2d8   : > { %v2797_v30 = vpop.xlane.xlu1 %2796 }
 0x2d9   : > { %v2806_v6 = vmul.f32 0.00390625, %v2797_v30  ;;  %2855 = vadd.xlane.f32.xlu1 %v2854_v37  ;;  %v2835_v45 = vmul.f32 %v5064_v35, %v5064_v35  ;;  %v2836_v9 = vmul.f32 %v5066_v36, %v5066_v36 }
 0x2db   : > { %v5072_v59 = vsub.f32 %v2772_v62, %v2806_v6  ;;  %v5074_v60 = vsub.f32 %v2773_v63, %v2806_v6  ;;  %v2857_v40 = vadd.f32 %v2836_v9, %v2835_v45 }
 0x2dd   : > { %2858 = vadd.xlane.f32.xlu0 %v2857_v40  ;;  %v2837_v44 = vmul.f32 %v5072_v59, %v5072_v59  ;;  %v2838_v58 = vmul.f32 %v5074_v60, %v5074_v60 }
 0x2df   : > { %v2860_v48 = vadd.f32 %v2838_v58, %v2837_v44 }
 0x2e1   : > { %2861 = vadd.xlane.f32.xlu1 %v2860_v48 }
 0x34e   : > { %v2841_v39 = vpop.xlane.xlu0 %2840 }
 0x34f   : > { %v2863_v38 = vmul.f32 0.003921569, %v2841_v39 }
 0x351   : > { %3708 = vrsqrt.f32 %v2863_v38  ;;  %vm2873_vm0 = vcmp.eq.f32.partialorder %v2863_v38, inf  ;;  %v2876_v12 = vand.u32 2147483648, %v2863_v38  ;;  %vm2875_vm1 = vcmp.eq.f32.partialorder %v2863_v38, 0.0 }
 0x352   : > { %v2844_v52 = vpop.xlane.xlu1 %2843 }
 0x353   : > { %v2864_v53 = vmul.f32 0.003921569, %v2844_v52 }
 0x355   : > { %3710 = vrsqrt.f32 %v2864_v53  ;;  %vm2880_vm2 = vcmp.eq.f32.partialorder %v2864_v53, inf  ;;  %v2883_v46 = vand.u32 2147483648, %v2864_v53  ;;  %vm2882_vm3 = vcmp.eq.f32.partialorder %v2864_v53, 0.0 }
 0x356   : > { %v2847_v62 = vpop.xlane.xlu0 %2846 }
 0x357   : > { %v2865_v55 = vmul.f32 0.003921569, %v2847_v62 }
 0x359   : > { %3712 = vrsqrt.f32 %v2865_v55  ;;  %vm2887_vm4 = vcmp.eq.f32.partialorder %v2865_v55, inf  ;;  %v2890_v28 = vand.u32 2147483648, %v2865_v55  ;;  %vm2889_vm5 = vcmp.eq.f32.partialorder %v2865_v55, 0.0 }
 0x35a   : > { %v2850_v63 = vpop.xlane.xlu1 %2849 }
 0x35b   : > { %v2866_v7 = vmul.f32 0.003921569, %v2850_v63 }
 0x35d   : > { %3714 = vrsqrt.f32 %v2866_v7  ;;  %vm2894_vm6 = vcmp.eq.f32.partialorder %v2866_v7, inf  ;;  %v2897_v47 = vand.u32 2147483648, %v2866_v7  ;;  %vm2896_vm7 = vcmp.eq.f32.partialorder %v2866_v7, 0.0 }
 0x35e   : > { %v3709_v20 = vpop.eup %3708  ;;  %v2853_v56 = vpop.xlane.xlu0 %2852 }
 0x35f   : > { %v2872_v10 = vmul.f32 %v3709_v20, %v2863_v38  ;;  %v2867_v23 = vmul.f32 0.003921569, %v2853_v56 }
 0x361   : > { %v2874_v16 = vsel %vm2873_vm0, %v2863_v38, %v2872_v10  ;;  %3716 = vrsqrt.f32 %v2867_v23  ;;  %vm2901_vm8 = vcmp.eq.f32.partialorder %v2867_v23, inf  ;;  %v2904_v40 = vand.u32 2147483648, %v2867_v23  ;;  %v2967_v38 = vld [vmem:[%s5264_s5] sm:$0x3] }
 0x362   : > { %v3711_v14 = vpop.eup %3710  ;;  %v2877_v51 = vsel %vm2875_vm1, %v2876_v12, %v2874_v16  ;;  %v2856_v17 = vpop.xlane.xlu1 %2855  ;;  %vm2903_vm9 = vcmp.eq.f32.partialorder %v2867_v23, 0.0  ;;  %v5105_v56 = vrot.slane %v2967_v38, %v4596_v43  ;;  %v5111_v12 = vrot.slane %v2967_v38, %v4588_v41 }
 0x363   : > { %v2927_v13 = vadd.f32 1e-06, %v2877_v51  ;;  %v2879_v1 = vmul.f32 %v3711_v14, %v2864_v53  ;;  %v5080_v18 = vmul.f32 0.003921569, %v2856_v17 }
 0x365   : > { %3718 = vrcp.f32 %v2927_v13  ;;  %v2881_v21 = vsel %vm2880_vm2, %v2864_v53, %v2879_v1  ;;  %vm2908_vm10 = vcmp.eq.f32.partialorder %v5080_v18, inf  ;;  %vm2910_vm11 = vcmp.eq.f32.partialorder %v5080_v18, 0.0 }
 0x366   : > { %v3713_v31 = vpop.eup %3712  ;;  %v2884_v2 = vsel %vm2882_vm3, %v2883_v46, %v2881_v21  ;;  %3720 = vrsqrt.f32 %v5080_v18  ;;  %v2859_v34 = vpop.xlane.xlu0 %2858 }
 0x367   : > { %v2928_v3 = vadd.f32 1e-06, %v2884_v2  ;;  %v2886_v8 = vmul.f32 %v3713_v31, %v2865_v55  ;;  %v5083_v50 = vmul.f32 0.003921569, %v2859_v34 }
 0x369   : > { %3722 = vrcp.f32 %v2928_v3  ;;  %v2888_v54 = vsel %vm2887_vm4, %v2865_v55, %v2886_v8  ;;  %v3011_v55 = vld [vmem:[%s5265_s6] sm:$0x3]  ;;  %vm2915_vm12 = vcmp.eq.f32.partialorder %v5083_v50, inf  ;;  %vm2917_vm13 = vcmp.eq.f32.partialorder %v5083_v50, 0.0 }
 0x36a   : > { %v3715_v29 = vpop.eup %3714  ;;  %v2891_v32 = vsel %vm2889_vm5, %v2890_v28, %v2888_v54  ;;  %3724 = vrsqrt.f32 %v5083_v50  ;;  %v2862_v15 = vpop.xlane.xlu1 %2861  ;;  %v5114_v17 = vrot.slane %v3011_v55, %v4596_v43 }
 0x36b   : > { %v2929_v33 = vadd.f32 1e-06, %v2891_v32  ;;  %v2893_v19 = vmul.f32 %v3715_v29, %v2866_v7  ;;  %v5086_v57 = vmul.f32 0.003921569, %v2862_v15 }
 0x36d   : > { %3726 = vrcp.f32 %v2929_v33  ;;  %v2895_v37 = vsel %vm2894_vm6, %v2866_v7, %v2893_v19  ;;  %v2911_v7 = vand.u32 2147483648, %v5080_v18  ;;  %vm2922_vm14 = vcmp.eq.f32.partialorder %v5086_v57, inf }
 0x36e   : > { %v3717_v30 = vpop.eup %3716  ;;  %v2898_v6 = vsel %vm2896_vm7, %v2897_v47, %v2895_v37  ;;  %3728 = vrsqrt.f32 %v5086_v57  ;;  %v2925_v29 = vand.u32 2147483648, %v5086_v57  ;;  %vm2924_vm15 = vcmp.eq.f32.partialorder %v5086_v57, 0.0 }
 0x36f   : > { %v5089_v45 = vadd.f32 1e-06, %v2898_v6  ;;  %v2900_v9 = vmul.f32 %v3717_v30, %v2867_v23 }
 0x371   : > { %3730 = vrcp.f32 %v5089_v45  ;;  %v2902_v44 = vsel %vm2901_vm8, %v2867_v23, %v2900_v9 }
 0x372   : > { %v3719_v58 = vpop.eup %3718  ;;  %v2905_v48 = vsel %vm2903_vm9, %v2904_v40, %v2902_v44 }
 0x373   : > { %v3721_v39 = vpop.eup %3720  ;;  %v2943_v52 = vmul.f32 %v3719_v58, %v2927_v13  ;;  %v5095_v53 = vadd.f32 1e-06, %v2905_v48  ;;  %v5117_v13 = vrot.slane %v3011_v55, %v4588_v41  ;;  %v2918_v41 = vand.u32 2147483648, %v5083_v50 }
 0x374   : > { %v2907_v62 = vmul.f32 %v3721_v39, %v5080_v18 }
 0x375   : > { %v2951_v63 = vsub.f32 2.0, %v2943_v52  ;;  %3732 = vrcp.f32 %v5095_v53 }
 0x376   : > { %v3723_v20 = vpop.eup %3722  ;;  %v2909_v10 = vsel %vm2908_vm10, %v5080_v18, %v2907_v62 }
 0x377   : > { %v3725_v23 = vpop.eup %3724  ;;  %v2959_v16 = vmul.f32 %v3719_v58, %v2951_v63  ;;  %v2944_v14 = vmul.f32 %v3723_v20, %v2928_v3  ;;  %v2912_v51 = vsel %vm2910_vm11, %v2911_v7, %v2909_v10 }
 0x378   : > { %v5119_v1 = vadd.f32 1e-06, %v2912_v51  ;;  %v2914_v46 = vmul.f32 %v3725_v23, %v5083_v50 }
 0x379   : > { %v2968_v18 = vmul.f32 %v2959_v16, %v5005_v42  ;;  %v2969_v21 = vmul.f32 %v2959_v16, %v5008_v0  ;;  %v2952_v31 = vsub.f32 2.0, %v2944_v14 }
 0x37a   : > { %v3727_v2 = vpop.eup %3726  ;;  %3734 = vrcp.f32 %v5119_v1  ;;  %v2916_v43 = vsel %vm2915_vm12, %v5083_v50, %v2914_v46 }
 0x37b   : > { %v3729_v34 = vpop.eup %3728  ;;  %v2995_v3 = vmul.f32 %v5105_v56, %v2968_v18  ;;  %v2996_v8 = vmul.f32 %v5111_v12, %v2969_v21  ;;  %v2960_v42 = vmul.f32 %v3723_v20, %v2952_v31  ;;  %v2945_v28 = vmul.f32 %v3727_v2, %v2929_v33 }
 0x37c   : > { %v2919_v0 = vsel %vm2917_vm13, %v2918_v41, %v2916_v43  ;;  %v2921_v54 = vmul.f32 %v3729_v34, %v5086_v57 }
 0x37d   : > { %v3023_v32 = vadd.f32 %v5114_v17, %v2995_v3  ;;  %v3024_v15 = vadd.f32 %v5117_v13, %v2996_v8  ;;  %v2970_v50 = vmul.f32 %v2960_v42, %v5015_v24  ;;  %v2971_v19 = vmul.f32 %v2960_v42, %v5018_v11 }
 0x37e   : > { %v3731_v47 = vpop.eup %3730  ;;  %v2953_v37 = vsub.f32 2.0, %v2945_v28  ;;  %v2933_v30 = vadd.f32 1e-06, %v2919_v0  ;;  %v2923_v33 = vsel %vm2922_vm14, %v5086_v57, %v2921_v54 }
 0x37f   : > { %3039 = vst [vmem:[%s5142_s22] sm:$0xff] %v3023_v32  ;;  %3040 = vst [vmem:[%s5142_s22 + $0x8] sm:$0xff] %v3024_v15  ;;  %v2997_v6 = vmul.f32 %v5105_v56, %v2970_v50  ;;  %v2998_v24 = vmul.f32 %v5111_v12, %v2971_v19  ;;  %v2946_v11 = vmul.f32 %v3731_v47, %v5089_v45 }
 0x380   : > { %v2926_v9 = vsel %vm2924_vm15, %v2925_v29, %v2923_v33  ;;  %v2961_v40 = vmul.f32 %v3727_v2, %v2953_v37  ;;  %3736 = vrcp.f32 %v2933_v30 }
 0x381   : > { %v2934_v44 = vadd.f32 1e-06, %v2926_v9  ;;  %v3025_v57 = vadd.f32 %v5114_v17, %v2997_v6  ;;  %v3026_v58 = vadd.f32 %v5117_v13, %v2998_v24  ;;  %v2954_v48 = vsub.f32 2.0, %v2946_v11 }
 0x382   : > { %v3733_v39 = vpop.eup %3732  ;;  %v2972_v38 = vmul.f32 %v2961_v40, %v5025_v26  ;;  %v2973_v52 = vmul.f32 %v2961_v40, %v5028_v49 }
 0x383   : > { %3738 = vrcp.f32 %v2934_v44  ;;  %3041 = vst [vmem:[%s5142_s22 + $0x10] sm:$0xff] %v3025_v57  ;;  %3042 = vst [vmem:[%s5142_s22 + $0x18] sm:$0xff] %v3026_v58  ;;  %v2962_v45 = vmul.f32 %v3731_v47, %v2954_v48  ;;  %v2947_v62 = vmul.f32 %v3733_v39, %v5095_v53 }
 0x384   : > { %v2999_v55 = vmul.f32 %v5105_v56, %v2972_v38  ;;  %v3000_v63 = vmul.f32 %v5111_v12, %v2973_v52 }
 0x385   : > { %v2974_v7 = vmul.f32 %v2962_v45, %v5035_v22  ;;  %v2975_v20 = vmul.f32 %v2962_v45, %v5038_v61  ;;  %v2955_v26 = vsub.f32 2.0, %v2947_v62 }
 0x386   : > { %v3027_v49 = vadd.f32 %v5114_v17, %v2999_v55  ;;  %v3028_v10 = vadd.f32 %v5117_v13, %v3000_v63 }
 0x387   : > { %v3735_v23 = vpop.eup %3734  ;;  %v3001_v16 = vmul.f32 %v5105_v56, %v2974_v7  ;;  %v3002_v53 = vmul.f32 %v5111_v12, %v2975_v20  ;;  %v2963_v14 = vmul.f32 %v3733_v39, %v2955_v26 }
 0x388   : > { %3043 = vst [vmem:[%s5142_s22 + $0x20] sm:$0xff] %v3027_v49  ;;  %3044 = vst [vmem:[%s5142_s22 + $0x28] sm:$0xff] %v3028_v10  ;;  %v2948_v51 = vmul.f32 %v3735_v23, %v5119_v1 }
 0x389   : > { %v3029_v22 = vadd.f32 %v5114_v17, %v3001_v16  ;;  %v3030_v61 = vadd.f32 %v5117_v13, %v3002_v53  ;;  %v2976_v46 = vmul.f32 %v2963_v14, %v5045_v25  ;;  %v2977_v18 = vmul.f32 %v2963_v14, %v5048_v27 }
 0x38a   : > { %v2956_v21 = vsub.f32 2.0, %v2948_v51 }
 0x38b   : > { %3045 = vst [vmem:[%s5142_s22 + $0x30] sm:$0xff] %v3029_v22  ;;  %3046 = vst [vmem:[%s5142_s22 + $0x38] sm:$0xff] %v3030_v61  ;;  %v3003_v31 = vmul.f32 %v5105_v56, %v2976_v46  ;;  %v3004_v2 = vmul.f32 %v5111_v12, %v2977_v18 }
 0x38c   : > { %v2964_v43 = vmul.f32 %v3735_v23, %v2956_v21 }
 0x38d   : > { %v3737_v41 = vpop.eup %3736  ;;  %v3031_v1 = vadd.f32 %v5114_v17, %v3003_v31  ;;  %v3032_v34 = vadd.f32 %v5117_v13, %v3004_v2 }
 0x38e   : > { %v2978_v25 = vmul.f32 %v2964_v43, %v5055_v4  ;;  %v2979_v3 = vmul.f32 %v2964_v43, %v5058_v5  ;;  %v2949_v27 = vmul.f32 %v3737_v41, %v2933_v30 }
 0x38f   : > { %3047 = vst [vmem:[%s5142_s22 + $0x40] sm:$0xff] %v3031_v1  ;;  %3048 = vst [vmem:[%s5142_s22 + $0x48] sm:$0xff] %v3032_v34 }
 0x390   : > { %v3739_v8 = vpop.eup %3738  ;;  %v3005_v42 = vmul.f32 %v5105_v56, %v2978_v25  ;;  %v3006_v28 = vmul.f32 %v5111_v12, %v2979_v3  ;;  %v2957_v0 = vsub.f32 2.0, %v2949_v27 }
 0x391   : > { %v2950_v54 = vmul.f32 %v3739_v8, %v2934_v44 }
 0x392   : > { %v3033_v29 = vadd.f32 %v5114_v17, %v3005_v42  ;;  %v3034_v32 = vadd.f32 %v5117_v13, %v3006_v28  ;;  %v2965_v15 = vmul.f32 %v3737_v41, %v2957_v0 }
 0x393   : > { %v2958_v4 = vsub.f32 2.0, %v2950_v54 }
 0x394   : > { %3049 = vst [vmem:[%s5142_s22 + $0x50] sm:$0xff] %v3033_v29  ;;  %3050 = vst [vmem:[%s5142_s22 + $0x58] sm:$0xff] %v3034_v32  ;;  %v2980_v5 = vmul.f32 %v2965_v15, %v5064_v35  ;;  %v2981_v50 = vmul.f32 %v2965_v15, %v5066_v36 }
 0x395   : > { %v2966_v19 = vmul.f32 %v3739_v8, %v2958_v4 }
 0x396   : > { %v3007_v47 = vmul.f32 %v5105_v56, %v2980_v5  ;;  %v3008_v37 = vmul.f32 %v5111_v12, %v2981_v50 }
 0x397   : > { %v2982_v30 = vmul.f32 %v2966_v19, %v5072_v59  ;;  %v2983_v33 = vmul.f32 %v2966_v19, %v5074_v60 }
 0x398   : > { %v3035_v35 = vadd.f32 %v5114_v17, %v3007_v47  ;;  %v3036_v6 = vadd.f32 %v5117_v13, %v3008_v37 }
 0x399   : > { %v3009_v36 = vmul.f32 %v5105_v56, %v2982_v30  ;;  %v3010_v24 = vmul.f32 %v5111_v12, %v2983_v33 }
 0x39a   : > { %3051 = vst [vmem:[%s5142_s22 + $0x60] sm:$0xff] %v3035_v35  ;;  %3052 = vst [vmem:[%s5142_s22 + $0x68] sm:$0xff] %v3036_v6 }
 0x39b   : > { %v3037_v59 = vadd.f32 %v5114_v17, %v3009_v36  ;;  %v3038_v60 = vadd.f32 %v5117_v13, %v3010_v24 }
 0x39d   : > { %3053 = vst [vmem:[%s5142_s22 + $0x70] sm:$0xff] %v3037_v59  ;;  %3054 = vst [vmem:[%s5142_s22 + $0x78] sm:$0xff] %v3038_v60 }
 0x39e   : > { %3769 = shalt.err (!%p3766_p5)
}
 0x39f   : > { %s3770_s19 = scalar_lea.hbm %s5202_s15, 2048  ;;  %s3774_s22 = scalar_lea.hbm %s5266_s7, 4096 }
 0x3a0   : > { %p3771_p6 = scmp.ne.s32.totalorder %s5202_s15, %s3770_s19  ;;  %p3775_p10 = scmp.lt.s32.totalorder %s5202_s15, %s5266_s7 }
 0x3a1   : > { %p3776_p11 = scmp.lt.s32.totalorder %s3774_s22, %s3770_s19 }
 0x3a2   : > { %p3772_p7 = pnand %p3771_p6, %p3917_p4 }
 0x3a3   : > { %p3777_p12 = por %p3776_p11, %p3775_p10 }
 0x3a4   : > { %p3773_p9 = pneg %p3772_p7 }
 0x3a6   : > { %p3778_p13 = pnand %p3777_p12, %p3773_p9 }
 0x3a8   : > { %3781 = shalt.err (!%p3778_p13)
}
 0x3a9   : > { %s3835_s12 = smov 256   ;;  %s3836_s16 = smov 16  }
 0x3aa   : > { %3459 = dma.vmem_to_hbm [thread:$0]  (%p3917_p4), %s5204_s30, 2048, %s5202_s15, %s5214_s27, %s3835_s12, %s3835_s12, %s3836_s16  }
 0x3ab PF: > { %p3465_p0 = scmp.ge.s32.totalorder %s3832_s29, 2  ;;  %s3085_s10 = sand.u32 1, %s3812_s24  }
 0x3ac   : > { %s3086_s17 = scalar_lea.sflag [#allocation4], %s3085_s10 }
 0x3ad   : > { %p3462_p1 = pnand %p3465_p0, %p3924_p8 }
 0x3af   : > { %p3463_p2 = pneg %p3462_p1 }
 0x3b1   : > { %3807 = dma.done.wait (%p3463_p2), %s3086_s17, 2048  }
 0x3b2   : > { %3809 = vsyncadd (%p3463_p2), %s3086_s17, 4294965248  ;;  %s20_s29 = sadd.s32 1, %s3832_s29   ;;  %s5269_s24 = smov %s3816_s25 }
 0x3b3   : > { %p17_p3 = scmp.ge.s32.totalorder %s20_s29, 4   ;;  %s5270_s25 = smov %s3820_s26 }
 0x3b4   : > { %s5271_s26 = smov %s3930_s14  ;;  %s5272_s27 = smov %s3828_s28 }
 0x3b5   : > { %s5273_s28 = smov %s5275_s9  ;;  %19 = sbr.rel (!%p17_p3) target bundleno = 4 (0x4), region = 100 }
 0x3ba   :  { %3091 = vsyncpa [#allocation4], 1 }
 0x3bb   :  { %3093 = vsyncpa [#allocation4 + $0x1], 1 }

</bundles_post_ra>
